<compile_context>
chip_gen: v5e
topology: v5e:2x2
jax: 0.10.0
libtpu: 0.0.40
codegen_flags: <defaults>
</compile_context>

<pallas_src>
import functools

import jax
import jax.numpy as jnp
from jax import lax
from jax.experimental import pallas as pl
from jax.experimental.pallas import tpu as pltpu

_EPS_NORM = 1e-12   # torch F.normalize eps
_EPS_DIST = 1e-6    # torch F.pairwise_distance eps (added to the difference)
_MARGIN = 0.1       # TripletMarginWithDistanceLoss margin


def _visualhunt_kernel(img_ref, pos_ref, neg_ref,
                       wv_ref, bv_ref, wt_ref, bt_ref,
                       out_ref, acc_ref, *, total_batch):
    step = pl.program_id(0)
    last = pl.num_programs(0) - 1

    @pl.when(step == 0)
    def _():
        acc_ref[...] = jnp.zeros_like(acc_ref)

    def l2_normalize(x):
        # F.normalize(x, p=2, dim=1): x / max(||x||_2, eps)
        #   == x * rsqrt(max(sum(x*x), eps^2))   (single EUP rsqrt, 2-D keepdims)
        sumsq = jnp.sum(x * x, axis=1, keepdims=True)
        return x * lax.rsqrt(jnp.maximum(sumsq, jnp.float32(_EPS_NORM * _EPS_NORM)))

    # Inputs may stream in as bf16; normalize in f32, then cast the matmul
    # operands to the weights' dtype (bf16 fast path, f32 verification path).
    mm_dtype = wv_ref.dtype
    img = l2_normalize(img_ref[...].astype(jnp.float32)).astype(mm_dtype)
    pos = l2_normalize(pos_ref[...].astype(jnp.float32)).astype(mm_dtype)
    neg = l2_normalize(neg_ref[...].astype(jnp.float32)).astype(mm_dtype)

    # Anchor: vision projection + ReLU (f32 accumulation on the MXU).
    a = jnp.maximum(
        jnp.dot(img, wv_ref[...], preferred_element_type=jnp.float32)
        + bv_ref[...], 0.0)
    # pos/neg share text_projection: two dots against the resident weights
    # (no per-step concat copy through VMEM).
    p = jnp.maximum(
        jnp.dot(pos, wt_ref[...], preferred_element_type=jnp.float32)
        + bt_ref[...], 0.0)
    n = jnp.maximum(
        jnp.dot(neg, wt_ref[...], preferred_element_type=jnp.float32)
        + bt_ref[...], 0.0)

    # TODO(synk): nn.Dropout(0.1) is identity in eval mode; training-mode
    # stochastic masking (matching torch RNG) is omitted.

    # F.pairwise_distance(x, y, p=2): || x - y + eps ||_2 per row.
    # Reductions kept 2-D (Bt, 1) to stay in the natural (8, 128) layout.
    def pdist(x, y):
        d = x - y + jnp.float32(_EPS_DIST)
        return jnp.sqrt(jnp.sum(d * d, axis=1, keepdims=True))

    per_ex = jnp.maximum(pdist(a, p) - pdist(a, n) + jnp.float32(_MARGIN), 0.0)
    # Hot-loop accumulation is a single VALU add into the VMEM scratch.
    acc_ref[...] += per_ex

    @pl.when(step == last)
    def _():
        # TripletMarginWithDistanceLoss(reduction='mean'): one cross-sublane
        # reduce + one SMEM scalar write, only in the epilogue.
        out_ref[0, 0] = jnp.sum(acc_ref[...]) * jnp.float32(1.0 / total_batch)


def visualhunt_loss(image_emb, pos_attr_emb, neg_attr_emb,
                    w_vision, b_vision, w_text, b_text, *,
                    batch_tile=None,
                    matmul_dtype=jnp.bfloat16,
                    vmem_limit_bytes=64 * 1024 * 1024,
                    single_buffer_weights=True):
    """Fused VisualHuntNetwork forward (returns the scalar triplet loss).

    Embeddings may be passed as bf16 (recommended for production: halves the
    streamed HBM bytes); weights are cast to `matmul_dtype` here, biases are
    kept f32.
    """
    B, Dv = image_emb.shape
    _, Dt = pos_attr_emb.shape
    P = w_vision.shape[1]

    if batch_tile is None:
        # Bigger tiles amortize the ~0.35 µs/step overhead; 512 rows of
        # bf16 activations + single-buffered weights fit the 64 MiB
        # vmem_limit below on all of v5e/v6e/v7x at ViT/SBERT dims.
        batch_tile = min(B, 512)
    # TODO(synk): ragged batches unsupported; a padded tail would need masking
    # in per_ex before the mean.
    assert B % batch_tile == 0, "batch must be divisible by batch_tile"
    num_tiles = B // batch_tile

    w_vision = w_vision.astype(matmul_dtype)
    w_text = w_text.astype(matmul_dtype)
    b_vision = b_vision.astype(jnp.float32)
    b_text = b_text.astype(jnp.float32)

    kernel = functools.partial(_visualhunt_kernel, total_batch=B)

    def build(weight_kwargs):
        def wspec(shape):
            # weights / biases: constant block index -> VMEM-resident across
            # all grid steps (never re-DMA'd).
            return pl.BlockSpec(shape, lambda i: (0, 0), **weight_kwargs)

        return pl.pallas_call(
            kernel,
            out_shape=jax.ShapeDtypeStruct((1, 1), jnp.float32),
            grid_spec=pltpu.PrefetchScalarGridSpec(
                num_scalar_prefetch=0,
                grid=(num_tiles,),
                in_specs=[
                    # activations: blocked on batch (double-buffered stream)
                    pl.BlockSpec((batch_tile, Dv), lambda i: (i, 0)),
                    pl.BlockSpec((batch_tile, Dt), lambda i: (i, 0)),
                    pl.BlockSpec((batch_tile, Dt), lambda i: (i, 0)),
                    wspec((Dv, P)),
                    wspec((1, P)),
                    wspec((Dt, P)),
                    wspec((1, P)),
                ],
                # scalar loss lives in SMEM: no masked vector store / padded tile
                out_specs=pl.BlockSpec(memory_space=pltpu.MemorySpace.SMEM),
                # per-tile hinge accumulator stays in VMEM across grid steps
                scratch_shapes=[pltpu.VMEM((batch_tile, 1), jnp.float32)],
            ),
            compiler_params=pltpu.CompilerParams(
                # batch axis carries a shared accumulator -> "arbitrary"
                dimension_semantics=("arbitrary",),
                vmem_limit_bytes=vmem_limit_bytes),
        )

    args = (image_emb, pos_attr_emb, neg_attr_emb,
            w_vision, b_vision, w_text, b_text)

    if single_buffer_weights:
        try:
            out = build({"pipeline_mode": pl.Buffered(buffer_count=1)})(*args)
            return jax.block_until_ready(out)[0, 0]
        except Exception:
            # TODO(synk): fall back when the installed jax rejects
            # pipeline_mode on top-level pallas_call BlockSpecs.
            pass
    out = build({})(*args)
    return jax.block_until_ready(out)[0, 0]


def _reference_loss(image_emb, pos_attr_emb, neg_attr_emb,
                    w_vision, b_vision, w_text, b_text):
    """Pure-JAX f32 reference mirroring the PyTorch forward."""
    def l2n(x):
        n = jnp.sqrt(jnp.sum(x * x, axis=1, keepdims=True))
        return x / jnp.maximum(n, _EPS_NORM)

    a = jax.nn.relu(l2n(image_emb) @ w_vision + b_vision)
    p = jax.nn.relu(l2n(pos_attr_emb) @ w_text + b_text)
    n = jax.nn.relu(l2n(neg_attr_emb) @ w_text + b_text)
    d_ap = jnp.sqrt(jnp.sum((a - p + _EPS_DIST) ** 2, axis=1))
    d_an = jnp.sqrt(jnp.sum((a - n + _EPS_DIST) ** 2, axis=1))
    return jnp.mean(jax.nn.relu(d_ap - d_an + _MARGIN))


if __name__ == "__main__":
    # Small but lane-dense shapes consistent with the module's forward:
    #   anchor image embeddings  (B, vision_dim)
    #   pos/neg text embeddings  (B, text_dim)
    # batch_tile=16 keeps bf16 blocks sublane-packed and gives a 2-step grid
    # that exercises the accumulator / epilogue path.
    B, vision_dim, text_dim, proj_dim = 32, 256, 128, 128
    batch_tile = 16

    key = jax.random.PRNGKey(0)
    k_img, k_pos, k_neg, k_wv, k_bv, k_wt, k_bt = jax.random.split(key, 7)

    image_emb = jax.random.normal(k_img, (B, vision_dim), jnp.float32)
    pos_attr_emb = jax.random.normal(k_pos, (B, text_dim), jnp.float32)
    neg_attr_emb = jax.random.normal(k_neg, (B, text_dim), jnp.float32)

    # Deterministic "Linear" parameters (stored (in_dim, out_dim) / (1, out)).
    w_vision = jax.random.normal(k_wv, (vision_dim, proj_dim), jnp.float32) * 0.05
    b_vision = jax.random.normal(k_bv, (1, proj_dim), jnp.float32) * 0.05
    w_text = jax.random.normal(k_wt, (text_dim, proj_dim), jnp.float32) * 0.05
    b_text = jax.random.normal(k_bt, (1, proj_dim), jnp.float32) * 0.05

    ref = jax.block_until_ready(
        _reference_loss(image_emb, pos_attr_emb, neg_attr_emb,
                        w_vision, b_vision, w_text, b_text))

    # 1) f32 matmul path: tight check against the torch-equivalent reference.
    loss_f32 = visualhunt_loss(image_emb, pos_attr_emb, neg_attr_emb,
                               w_vision, b_vision, w_text, b_text,
                               batch_tile=batch_tile,
                               matmul_dtype=jnp.float32)
    loss_f32 = jax.block_until_ready(loss_f32)
    assert jnp.allclose(loss_f32, ref, atol=1e-4, rtol=1e-4), (loss_f32, ref)

    # 2) bf16 fast path: bf16-streamed embeddings + bf16 MXU operands
    #    (f32 accumulation).  Looser tolerance vs the f32 reference.
    loss_bf16 = visualhunt_loss(image_emb.astype(jnp.bfloat16),
                                pos_attr_emb.astype(jnp.bfloat16),
                                neg_attr_emb.astype(jnp.bfloat16),
                                w_vision, b_vision, w_text, b_text,
                                batch_tile=batch_tile,
                                matmul_dtype=jnp.bfloat16)
    loss_bf16 = jax.block_until_ready(loss_bf16)
    assert jnp.allclose(loss_bf16, ref, atol=1e-2, rtol=5e-2), (loss_bf16, ref)

    print("KERNEL_OK")
</pallas_src>

<mosaic_0001>
module attributes {stable_mosaic.version = 11 : i64} {
  func.func @_visualhunt_kernel(%arg0: i32, %arg1: memref<16x256xf32, #tpu.memory_space<vmem>>, %arg2: memref<16x128xf32, #tpu.memory_space<vmem>>, %arg3: memref<16x128xf32, #tpu.memory_space<vmem>>, %arg4: memref<256x128xf32, #tpu.memory_space<vmem>>, %arg5: memref<1x128xf32, #tpu.memory_space<vmem>>, %arg6: memref<128x128xf32, #tpu.memory_space<vmem>>, %arg7: memref<1x128xf32, #tpu.memory_space<vmem>>, %arg8: memref<1x1xf32, #tpu.memory_space<smem>>, %arg9: memref<16x1xf32, #tpu.memory_space<vmem>>) attributes {dimension_semantics = [#tpu.dimension_semantics<arbitrary>], iteration_bounds = array<i64: 2>, scalar_prefetch = 0 : i64, scratch_operands = 1 : i64, tpu.core_type = #tpu.core_type<tc>, window_params = [{transform_indices = @transform_0, window_bounds = array<i64: 16, 256>}, {transform_indices = @transform_1, window_bounds = array<i64: 16, 128>}, {transform_indices = @transform_2, window_bounds = array<i64: 16, 128>}, {pipeline_mode = #tpu.pipeline_mode<synchronous>, transform_indices = @transform_3, window_bounds = array<i64: 256, 128>}, {pipeline_mode = #tpu.pipeline_mode<synchronous>, transform_indices = @transform_4, window_bounds = array<i64: 1, 128>}, {pipeline_mode = #tpu.pipeline_mode<synchronous>, transform_indices = @transform_5, window_bounds = array<i64: 128, 128>}, {pipeline_mode = #tpu.pipeline_mode<synchronous>, transform_indices = @transform_6, window_bounds = array<i64: 1, 128>}, {transform_indices = @transform_7, window_bounds = array<i64: 1, 1>}]} {
    %c0_i32 = arith.constant 0 : i32
    %0 = arith.cmpi eq, %arg0, %c0_i32 : i32
    %1 = arith.extui %0 : i1 to i32
    %c0_i32_0 = arith.constant 0 : i32
    %2 = arith.cmpi ne, %1, %c0_i32_0 : i32
    scf.if %2 {
      %cst_40 = arith.constant 0.000000e+00 : f32
      %76 = vector.broadcast %cst_40 : f32 to vector<16x1xf32>
      %c0_41 = arith.constant 0 : index
      %c0_42 = arith.constant 0 : index
      %77 = vector.load %arg9[%c0_41, %c0_42] : memref<16x1xf32, #tpu.memory_space<vmem>>, vector<16x1xf32>
      tpu.vector_store %arg9[%c0_41, %c0_42], %76 {strides = array<i32>} : memref<16x1xf32, #tpu.memory_space<vmem>>, vector<16x1xf32>,
    } else {
    }
    %c0 = arith.constant 0 : index
    %c0_1 = arith.constant 0 : index
    %3 = vector.load %arg1[%c0, %c0_1] : memref<16x256xf32, #tpu.memory_space<vmem>>, vector<16x256xf32>
    %4 = arith.mulf %3, %3 : vector<16x256xf32>
    %cst = arith.constant dense<0.000000e+00> : vector<16xf32>
    %5 = vector.multi_reduction <add>, %4, %cst [1] : vector<16x256xf32> to vector<16xf32>
    %6 = vector.shape_cast %5 : vector<16xf32> to vector<16x1xf32>
    %cst_2 = arith.constant 1.000000e-24 : f32
    %7 = vector.broadcast %cst_2 : f32 to vector<16x1xf32>
    %8 = arith.maximumf %6, %7 : vector<16x1xf32>
    %9 = math.rsqrt %8 : vector<16x1xf32>
    %10 = vector.broadcast %9 : vector<16x1xf32> to vector<16x256xf32>
    %11 = arith.mulf %3, %10 : vector<16x256xf32>
    %c0_3 = arith.constant 0 : index
    %c0_4 = arith.constant 0 : index
    %12 = vector.load %arg2[%c0_3, %c0_4] : memref<16x128xf32, #tpu.memory_space<vmem>>, vector<16x128xf32>
    %13 = arith.mulf %12, %12 : vector<16x128xf32>
    %cst_5 = arith.constant dense<0.000000e+00> : vector<16xf32>
    %14 = vector.multi_reduction <add>, %13, %cst_5 [1] : vector<16x128xf32> to vector<16xf32>
    %15 = vector.shape_cast %14 : vector<16xf32> to vector<16x1xf32>
    %cst_6 = arith.constant 1.000000e-24 : f32
    %16 = vector.broadcast %cst_6 : f32 to vector<16x1xf32>
    %17 = arith.maximumf %15, %16 : vector<16x1xf32>
    %18 = math.rsqrt %17 : vector<16x1xf32>
    %19 = vector.broadcast %18 : vector<16x1xf32> to vector<16x128xf32>
    %20 = arith.mulf %12, %19 : vector<16x128xf32>
    %c0_7 = arith.constant 0 : index
    %c0_8 = arith.constant 0 : index
    %21 = vector.load %arg3[%c0_7, %c0_8] : memref<16x128xf32, #tpu.memory_space<vmem>>, vector<16x128xf32>
    %22 = arith.mulf %21, %21 : vector<16x128xf32>
    %cst_9 = arith.constant dense<0.000000e+00> : vector<16xf32>
    %23 = vector.multi_reduction <add>, %22, %cst_9 [1] : vector<16x128xf32> to vector<16xf32>
    %24 = vector.shape_cast %23 : vector<16xf32> to vector<16x1xf32>
    %cst_10 = arith.constant 1.000000e-24 : f32
    %25 = vector.broadcast %cst_10 : f32 to vector<16x1xf32>
    %26 = arith.maximumf %24, %25 : vector<16x1xf32>
    %27 = math.rsqrt %26 : vector<16x1xf32>
    %28 = vector.broadcast %27 : vector<16x1xf32> to vector<16x128xf32>
    %29 = arith.mulf %21, %28 : vector<16x128xf32>
    %c0_11 = arith.constant 0 : index
    %c0_12 = arith.constant 0 : index
    %30 = vector.load %arg4[%c0_11, %c0_12] : memref<256x128xf32, #tpu.memory_space<vmem>>, vector<256x128xf32>
    %cst_13 = arith.constant dense<0.000000e+00> : vector<16x128xf32>
    %31 = tpu.matmul %11, %30, %cst_13 {dimension_numbers = #tpu.dot_dimension_numbers<[1], [0], [0], [1], [0, 0, 1, 1], [], []>} : vector<16x256xf32>, vector<256x128xf32>, vector<16x128xf32> -> vector<16x128xf32>
    %c0_14 = arith.constant 0 : index
    %c0_15 = arith.constant 0 : index
    %32 = vector.load %arg5[%c0_14, %c0_15] : memref<1x128xf32, #tpu.memory_space<vmem>>, vector<1x128xf32>
    %33 = vector.broadcast %32 : vector<1x128xf32> to vector<16x128xf32>
    %34 = arith.addf %31, %33 : vector<16x128xf32>
    %cst_16 = arith.constant 0.000000e+00 : f32
    %35 = vector.broadcast %cst_16 : f32 to vector<16x128xf32>
    %36 = arith.maximumf %34, %35 : vector<16x128xf32>
    %c0_17 = arith.constant 0 : index
    %c0_18 = arith.constant 0 : index
    %37 = vector.load %arg6[%c0_17, %c0_18] : memref<128x128xf32, #tpu.memory_space<vmem>>, vector<128x128xf32>
    %cst_19 = arith.constant dense<0.000000e+00> : vector<16x128xf32>
    %38 = tpu.matmul %20, %37, %cst_19 {dimension_numbers = #tpu.dot_dimension_numbers<[1], [0], [0], [1], [0, 0, 1, 1], [], []>} : vector<16x128xf32>, vector<128x128xf32>, vector<16x128xf32> -> vector<16x128xf32>
    %c0_20 = arith.constant 0 : index
    %c0_21 = arith.constant 0 : index
    %39 = vector.load %arg7[%c0_20, %c0_21] : memref<1x128xf32, #tpu.memory_space<vmem>>, vector<1x128xf32>
    %40 = vector.broadcast %39 : vector<1x128xf32> to vector<16x128xf32>
    %41 = arith.addf %38, %40 : vector<16x128xf32>
    %cst_22 = arith.constant 0.000000e+00 : f32
    %42 = vector.broadcast %cst_22 : f32 to vector<16x128xf32>
    %43 = arith.maximumf %41, %42 : vector<16x128xf32>
    %c0_23 = arith.constant 0 : index
    %c0_24 = arith.constant 0 : index
    %44 = vector.load %arg6[%c0_23, %c0_24] : memref<128x128xf32, #tpu.memory_space<vmem>>, vector<128x128xf32>
    %cst_25 = arith.constant dense<0.000000e+00> : vector<16x128xf32>
    %45 = tpu.matmul %29, %44, %cst_25 {dimension_numbers = #tpu.dot_dimension_numbers<[1], [0], [0], [1], [0, 0, 1, 1], [], []>} : vector<16x128xf32>, vector<128x128xf32>, vector<16x128xf32> -> vector<16x128xf32>
    %c0_26 = arith.constant 0 : index
    %c0_27 = arith.constant 0 : index
    %46 = vector.load %arg7[%c0_26, %c0_27] : memref<1x128xf32, #tpu.memory_space<vmem>>, vector<1x128xf32>
    %47 = vector.broadcast %46 : vector<1x128xf32> to vector<16x128xf32>
    %48 = arith.addf %45, %47 : vector<16x128xf32>
    %cst_28 = arith.constant 0.000000e+00 : f32
    %49 = vector.broadcast %cst_28 : f32 to vector<16x128xf32>
    %50 = arith.maximumf %48, %49 : vector<16x128xf32>
    %51 = arith.subf %36, %43 : vector<16x128xf32>
    %cst_29 = arith.constant 9.99999997E-7 : f32
    %52 = vector.broadcast %cst_29 : f32 to vector<16x128xf32>
    %53 = arith.addf %51, %52 : vector<16x128xf32>
    %54 = arith.mulf %53, %53 : vector<16x128xf32>
    %cst_30 = arith.constant dense<0.000000e+00> : vector<16xf32>
    %55 = vector.multi_reduction <add>, %54, %cst_30 [1] : vector<16x128xf32> to vector<16xf32>
    %56 = vector.shape_cast %55 : vector<16xf32> to vector<16x1xf32>
    %57 = math.sqrt %56 : vector<16x1xf32>
    %58 = arith.subf %36, %50 : vector<16x128xf32>
    %cst_31 = arith.constant 9.99999997E-7 : f32
    %59 = vector.broadcast %cst_31 : f32 to vector<16x128xf32>
    %60 = arith.addf %58, %59 : vector<16x128xf32>
    %61 = arith.mulf %60, %60 : vector<16x128xf32>
    %cst_32 = arith.constant dense<0.000000e+00> : vector<16xf32>
    %62 = vector.multi_reduction <add>, %61, %cst_32 [1] : vector<16x128xf32> to vector<16xf32>
    %63 = vector.shape_cast %62 : vector<16xf32> to vector<16x1xf32>
    %64 = math.sqrt %63 : vector<16x1xf32>
    %65 = arith.subf %57, %64 : vector<16x1xf32>
    %cst_33 = arith.constant 1.000000e-01 : f32
    %66 = vector.broadcast %cst_33 : f32 to vector<16x1xf32>
    %67 = arith.addf %65, %66 : vector<16x1xf32>
    %cst_34 = arith.constant 0.000000e+00 : f32
    %68 = vector.broadcast %cst_34 : f32 to vector<16x1xf32>
    %69 = arith.maximumf %67, %68 : vector<16x1xf32>
    %c0_35 = arith.constant 0 : index
    %c0_36 = arith.constant 0 : index
    %70 = vector.load %arg9[%c0_35, %c0_36] : memref<16x1xf32, #tpu.memory_space<vmem>>, vector<16x1xf32>
    %71 = arith.addf %70, %69 : vector<16x1xf32>
    %c0_37 = arith.constant 0 : index
    %c0_38 = arith.constant 0 : index
    %72 = vector.load %arg9[%c0_37, %c0_38] : memref<16x1xf32, #tpu.memory_space<vmem>>, vector<16x1xf32>
    tpu.vector_store %arg9[%c0_37, %c0_38], %71 {strides = array<i32>} : memref<16x1xf32, #tpu.memory_space<vmem>>, vector<16x1xf32>,
    %c1_i32 = arith.constant 1 : i32
    %73 = arith.cmpi eq, %arg0, %c1_i32 : i32
    %74 = arith.extui %73 : i1 to i32
    %c0_i32_39 = arith.constant 0 : i32
    %75 = arith.cmpi ne, %74, %c0_i32_39 : i32
    scf.if %75 {
      %c0_40 = arith.constant 0 : index
      %c0_41 = arith.constant 0 : index
      %76 = vector.load %arg9[%c0_40, %c0_41] : memref<16x1xf32, #tpu.memory_space<vmem>>, vector<16x1xf32>
      %77 = vector.shape_cast %76 : vector<16x1xf32> to vector<1x16x1xf32>
      %cst_42 = arith.constant dense<0.000000e+00> : vector<1xf32>
      %78 = vector.multi_reduction <add>, %77, %cst_42 [1, 2] : vector<1x16x1xf32> to vector<1xf32>
      %79 = vector.shape_cast %78 : vector<1xf32> to vector<1x1x1xf32>
      %80 = vector.extract %79[0, 0, 0] : f32 from vector<1x1x1xf32>
      %cst_43 = arith.constant 3.125000e-02 : f32
      %81 = arith.mulf %80, %cst_43 : f32
      %c0_44 = arith.constant 0 : index
      %c0_45 = arith.constant 0 : index
      %82 = memref.load %arg8[%c0_44, %c0_45] : memref<1x1xf32, #tpu.memory_space<smem>>
      memref.store %81, %arg8[%c0_44, %c0_45] : memref<1x1xf32, #tpu.memory_space<smem>>
    } else {
    }
    return
  }
  func.func @transform_0(%arg0: i32) -> (i32, i32) {
    %c0_i32 = arith.constant 0 : i32
    %c0_i32_0 = arith.constant 0 : i32
    return %arg0, %c0_i32 : i32, i32
  }
  func.func @transform_1(%arg0: i32) -> (i32, i32) {
    %c0_i32 = arith.constant 0 : i32
    %c0_i32_0 = arith.constant 0 : i32
    return %arg0, %c0_i32 : i32, i32
  }
  func.func @transform_2(%arg0: i32) -> (i32, i32) {
    %c0_i32 = arith.constant 0 : i32
    %c0_i32_0 = arith.constant 0 : i32
    return %arg0, %c0_i32 : i32, i32
  }
  func.func @transform_3(%arg0: i32) -> (i32, i32) {
    %c0_i32 = arith.constant 0 : i32
    %c0_i32_0 = arith.constant 0 : i32
    %c0_i32_1 = arith.constant 0 : i32
    return %c0_i32, %c0_i32_0 : i32, i32
  }
  func.func @transform_4(%arg0: i32) -> (i32, i32) {
    %c0_i32 = arith.constant 0 : i32
    %c0_i32_0 = arith.constant 0 : i32
    %c0_i32_1 = arith.constant 0 : i32
    return %c0_i32, %c0_i32_0 : i32, i32
  }
  func.func @transform_5(%arg0: i32) -> (i32, i32) {
    %c0_i32 = arith.constant 0 : i32
    %c0_i32_0 = arith.constant 0 : i32
    %c0_i32_1 = arith.constant 0 : i32
    return %c0_i32, %c0_i32_0 : i32, i32
  }
  func.func @transform_6(%arg0: i32) -> (i32, i32) {
    %c0_i32 = arith.constant 0 : i32
    %c0_i32_0 = arith.constant 0 : i32
    %c0_i32_1 = arith.constant 0 : i32
    return %c0_i32, %c0_i32_0 : i32, i32
  }
  func.func @transform_7(%arg0: i32) -> (i32, i32) {
    %c0_i32 = arith.constant 0 : i32
    %c0_i32_0 = arith.constant 0 : i32
    %c0_i32_1 = arith.constant 0 : i32
    return %c0_i32, %c0_i32_0 : i32, i32
  }
}

module attributes {stable_mosaic.version = 11 : i64} {
  func.func @_visualhunt_kernel(%arg0: i32, %arg1: memref<16x256xf32, #tpu.memory_space<vmem>>, %arg2: memref<16x128xf32, #tpu.memory_space<vmem>>, %arg3: memref<16x128xf32, #tpu.memory_space<vmem>>, %arg4: memref<256x128xf32, #tpu.memory_space<vmem>>, %arg5: memref<1x128xf32, #tpu.memory_space<vmem>>, %arg6: memref<128x128xf32, #tpu.memory_space<vmem>>, %arg7: memref<1x128xf32, #tpu.memory_space<vmem>>, %arg8: memref<1x1xf32, #tpu.memory_space<smem>>, %arg9: memref<16x1xf32, #tpu.memory_space<vmem>>) attributes {dimension_semantics = [#tpu.dimension_semantics<arbitrary>], iteration_bounds = array<i64: 2>, scalar_prefetch = 0 : i64, scratch_operands = 1 : i64, tpu.core_type = #tpu.core_type<tc>, window_params = [{transform_indices = @transform_0, window_bounds = array<i64: 16, 256>}, {transform_indices = @transform_1, window_bounds = array<i64: 16, 128>}, {transform_indices = @transform_2, window_bounds = array<i64: 16, 128>}, {pipeline_mode = #tpu.pipeline_mode<synchronous>, transform_indices = @transform_3, window_bounds = array<i64: 256, 128>}, {pipeline_mode = #tpu.pipeline_mode<synchronous>, transform_indices = @transform_4, window_bounds = array<i64: 1, 128>}, {pipeline_mode = #tpu.pipeline_mode<synchronous>, transform_indices = @transform_5, window_bounds = array<i64: 128, 128>}, {pipeline_mode = #tpu.pipeline_mode<synchronous>, transform_indices = @transform_6, window_bounds = array<i64: 1, 128>}, {transform_indices = @transform_7, window_bounds = array<i64: 1, 1>}]} {
    %c0_i32 = arith.constant 0 : i32
    %0 = arith.cmpi eq, %arg0, %c0_i32 : i32
    %1 = arith.extui %0 : i1 to i32
    %c0_i32_0 = arith.constant 0 : i32
    %2 = arith.cmpi ne, %1, %c0_i32_0 : i32
    scf.if %2 {
      %cst_40 = arith.constant 0.000000e+00 : f32
      %76 = vector.broadcast %cst_40 : f32 to vector<16x1xf32>
      %c0_41 = arith.constant 0 : index
      %c0_42 = arith.constant 0 : index
      %77 = vector.load %arg9[%c0_41, %c0_42] : memref<16x1xf32, #tpu.memory_space<vmem>>, vector<16x1xf32>
      tpu.vector_store %arg9[%c0_41, %c0_42], %76 {strides = array<i32>} : memref<16x1xf32, #tpu.memory_space<vmem>>, vector<16x1xf32>,
    } else {
    }
    %c0 = arith.constant 0 : index
    %c0_1 = arith.constant 0 : index
    %3 = vector.load %arg1[%c0, %c0_1] : memref<16x256xf32, #tpu.memory_space<vmem>>, vector<16x256xf32>
    %4 = arith.mulf %3, %3 : vector<16x256xf32>
    %cst = arith.constant dense<0.000000e+00> : vector<16xf32>
    %5 = vector.multi_reduction <add>, %4, %cst [1] : vector<16x256xf32> to vector<16xf32>
    %6 = vector.shape_cast %5 : vector<16xf32> to vector<16x1xf32>
    %cst_2 = arith.constant 1.000000e-24 : f32
    %7 = vector.broadcast %cst_2 : f32 to vector<16x1xf32>
    %8 = arith.maximumf %6, %7 : vector<16x1xf32>
    %9 = math.rsqrt %8 : vector<16x1xf32>
    %10 = vector.broadcast %9 : vector<16x1xf32> to vector<16x256xf32>
    %11 = arith.mulf %3, %10 : vector<16x256xf32>
    %c0_3 = arith.constant 0 : index
    %c0_4 = arith.constant 0 : index
    %12 = vector.load %arg2[%c0_3, %c0_4] : memref<16x128xf32, #tpu.memory_space<vmem>>, vector<16x128xf32>
    %13 = arith.mulf %12, %12 : vector<16x128xf32>
    %cst_5 = arith.constant dense<0.000000e+00> : vector<16xf32>
    %14 = vector.multi_reduction <add>, %13, %cst_5 [1] : vector<16x128xf32> to vector<16xf32>
    %15 = vector.shape_cast %14 : vector<16xf32> to vector<16x1xf32>
    %cst_6 = arith.constant 1.000000e-24 : f32
    %16 = vector.broadcast %cst_6 : f32 to vector<16x1xf32>
    %17 = arith.maximumf %15, %16 : vector<16x1xf32>
    %18 = math.rsqrt %17 : vector<16x1xf32>
    %19 = vector.broadcast %18 : vector<16x1xf32> to vector<16x128xf32>
    %20 = arith.mulf %12, %19 : vector<16x128xf32>
    %c0_7 = arith.constant 0 : index
    %c0_8 = arith.constant 0 : index
    %21 = vector.load %arg3[%c0_7, %c0_8] : memref<16x128xf32, #tpu.memory_space<vmem>>, vector<16x128xf32>
    %22 = arith.mulf %21, %21 : vector<16x128xf32>
    %cst_9 = arith.constant dense<0.000000e+00> : vector<16xf32>
    %23 = vector.multi_reduction <add>, %22, %cst_9 [1] : vector<16x128xf32> to vector<16xf32>
    %24 = vector.shape_cast %23 : vector<16xf32> to vector<16x1xf32>
    %cst_10 = arith.constant 1.000000e-24 : f32
    %25 = vector.broadcast %cst_10 : f32 to vector<16x1xf32>
    %26 = arith.maximumf %24, %25 : vector<16x1xf32>
    %27 = math.rsqrt %26 : vector<16x1xf32>
    %28 = vector.broadcast %27 : vector<16x1xf32> to vector<16x128xf32>
    %29 = arith.mulf %21, %28 : vector<16x128xf32>
    %c0_11 = arith.constant 0 : index
    %c0_12 = arith.constant 0 : index
    %30 = vector.load %arg4[%c0_11, %c0_12] : memref<256x128xf32, #tpu.memory_space<vmem>>, vector<256x128xf32>
    %cst_13 = arith.constant dense<0.000000e+00> : vector<16x128xf32>
    %31 = tpu.matmul %11, %30, %cst_13 {dimension_numbers = #tpu.dot_dimension_numbers<[1], [0], [0], [1], [0, 0, 1, 1], [], []>} : vector<16x256xf32>, vector<256x128xf32>, vector<16x128xf32> -> vector<16x128xf32>
    %c0_14 = arith.constant 0 : index
    %c0_15 = arith.constant 0 : index
    %32 = vector.load %arg5[%c0_14, %c0_15] : memref<1x128xf32, #tpu.memory_space<vmem>>, vector<1x128xf32>
    %33 = vector.broadcast %32 : vector<1x128xf32> to vector<16x128xf32>
    %34 = arith.addf %31, %33 : vector<16x128xf32>
    %cst_16 = arith.constant 0.000000e+00 : f32
    %35 = vector.broadcast %cst_16 : f32 to vector<16x128xf32>
    %36 = arith.maximumf %34, %35 : vector<16x128xf32>
    %c0_17 = arith.constant 0 : index
    %c0_18 = arith.constant 0 : index
    %37 = vector.load %arg6[%c0_17, %c0_18] : memref<128x128xf32, #tpu.memory_space<vmem>>, vector<128x128xf32>
    %cst_19 = arith.constant dense<0.000000e+00> : vector<16x128xf32>
    %38 = tpu.matmul %20, %37, %cst_19 {dimension_numbers = #tpu.dot_dimension_numbers<[1], [0], [0], [1], [0, 0, 1, 1], [], []>} : vector<16x128xf32>, vector<128x128xf32>, vector<16x128xf32> -> vector<16x128xf32>
    %c0_20 = arith.constant 0 : index
    %c0_21 = arith.constant 0 : index
    %39 = vector.load %arg7[%c0_20, %c0_21] : memref<1x128xf32, #tpu.memory_space<vmem>>, vector<1x128xf32>
    %40 = vector.broadcast %39 : vector<1x128xf32> to vector<16x128xf32>
    %41 = arith.addf %38, %40 : vector<16x128xf32>
    %cst_22 = arith.constant 0.000000e+00 : f32
    %42 = vector.broadcast %cst_22 : f32 to vector<16x128xf32>
    %43 = arith.maximumf %41, %42 : vector<16x128xf32>
    %c0_23 = arith.constant 0 : index
    %c0_24 = arith.constant 0 : index
    %44 = vector.load %arg6[%c0_23, %c0_24] : memref<128x128xf32, #tpu.memory_space<vmem>>, vector<128x128xf32>
    %cst_25 = arith.constant dense<0.000000e+00> : vector<16x128xf32>
    %45 = tpu.matmul %29, %44, %cst_25 {dimension_numbers = #tpu.dot_dimension_numbers<[1], [0], [0], [1], [0, 0, 1, 1], [], []>} : vector<16x128xf32>, vector<128x128xf32>, vector<16x128xf32> -> vector<16x128xf32>
    %c0_26 = arith.constant 0 : index
    %c0_27 = arith.constant 0 : index
    %46 = vector.load %arg7[%c0_26, %c0_27] : memref<1x128xf32, #tpu.memory_space<vmem>>, vector<1x128xf32>
    %47 = vector.broadcast %46 : vector<1x128xf32> to vector<16x128xf32>
    %48 = arith.addf %45, %47 : vector<16x128xf32>
    %cst_28 = arith.constant 0.000000e+00 : f32
    %49 = vector.broadcast %cst_28 : f32 to vector<16x128xf32>
    %50 = arith.maximumf %48, %49 : vector<16x128xf32>
    %51 = arith.subf %36, %43 : vector<16x128xf32>
    %cst_29 = arith.constant 9.99999997E-7 : f32
    %52 = vector.broadcast %cst_29 : f32 to vector<16x128xf32>
    %53 = arith.addf %51, %52 : vector<16x128xf32>
    %54 = arith.mulf %53, %53 : vector<16x128xf32>
    %cst_30 = arith.constant dense<0.000000e+00> : vector<16xf32>
    %55 = vector.multi_reduction <add>, %54, %cst_30 [1] : vector<16x128xf32> to vector<16xf32>
    %56 = vector.shape_cast %55 : vector<16xf32> to vector<16x1xf32>
    %57 = math.sqrt %56 : vector<16x1xf32>
    %58 = arith.subf %36, %50 : vector<16x128xf32>
    %cst_31 = arith.constant 9.99999997E-7 : f32
    %59 = vector.broadcast %cst_31 : f32 to vector<16x128xf32>
    %60 = arith.addf %58, %59 : vector<16x128xf32>
    %61 = arith.mulf %60, %60 : vector<16x128xf32>
    %cst_32 = arith.constant dense<0.000000e+00> : vector<16xf32>
    %62 = vector.multi_reduction <add>, %61, %cst_32 [1] : vector<16x128xf32> to vector<16xf32>
    %63 = vector.shape_cast %62 : vector<16xf32> to vector<16x1xf32>
    %64 = math.sqrt %63 : vector<16x1xf32>
    %65 = arith.subf %57, %64 : vector<16x1xf32>
    %cst_33 = arith.constant 1.000000e-01 : f32
    %66 = vector.broadcast %cst_33 : f32 to vector<16x1xf32>
    %67 = arith.addf %65, %66 : vector<16x1xf32>
    %cst_34 = arith.constant 0.000000e+00 : f32
    %68 = vector.broadcast %cst_34 : f32 to vector<16x1xf32>
    %69 = arith.maximumf %67, %68 : vector<16x1xf32>
    %c0_35 = arith.constant 0 : index
    %c0_36 = arith.constant 0 : index
    %70 = vector.load %arg9[%c0_35, %c0_36] : memref<16x1xf32, #tpu.memory_space<vmem>>, vector<16x1xf32>
    %71 = arith.addf %70, %69 : vector<16x1xf32>
    %c0_37 = arith.constant 0 : index
    %c0_38 = arith.constant 0 : index
    %72 = vector.load %arg9[%c0_37, %c0_38] : memref<16x1xf32, #tpu.memory_space<vmem>>, vector<16x1xf32>
    tpu.vector_store %arg9[%c0_37, %c0_38], %71 {strides = array<i32>} : memref<16x1xf32, #tpu.memory_space<vmem>>, vector<16x1xf32>,
    %c1_i32 = arith.constant 1 : i32
    %73 = arith.cmpi eq, %arg0, %c1_i32 : i32
    %74 = arith.extui %73 : i1 to i32
    %c0_i32_39 = arith.constant 0 : i32
    %75 = arith.cmpi ne, %74, %c0_i32_39 : i32
    scf.if %75 {
      %c0_40 = arith.constant 0 : index
      %c0_41 = arith.constant 0 : index
      %76 = vector.load %arg9[%c0_40, %c0_41] : memref<16x1xf32, #tpu.memory_space<vmem>>, vector<16x1xf32>
      %77 = vector.shape_cast %76 : vector<16x1xf32> to vector<1x16x1xf32>
      %cst_42 = arith.constant dense<0.000000e+00> : vector<1xf32>
      %78 = vector.multi_reduction <add>, %77, %cst_42 [1, 2] : vector<1x16x1xf32> to vector<1xf32>
      %79 = vector.shape_cast %78 : vector<1xf32> to vector<1x1x1xf32>
      %80 = vector.extract %79[0, 0, 0] : f32 from vector<1x1x1xf32>
      %cst_43 = arith.constant 3.125000e-02 : f32
      %81 = arith.mulf %80, %cst_43 : f32
      %c0_44 = arith.constant 0 : index
      %c0_45 = arith.constant 0 : index
      %82 = memref.load %arg8[%c0_44, %c0_45] : memref<1x1xf32, #tpu.memory_space<smem>>
      memref.store %81, %arg8[%c0_44, %c0_45] : memref<1x1xf32, #tpu.memory_space<smem>>
    } else {
    }
    return
  }
  func.func @transform_0(%arg0: i32) -> (i32, i32) {
    %c0_i32 = arith.constant 0 : i32
    %c0_i32_0 = arith.constant 0 : i32
    return %arg0, %c0_i32 : i32, i32
  }
  func.func @transform_1(%arg0: i32) -> (i32, i32) {
    %c0_i32 = arith.constant 0 : i32
    %c0_i32_0 = arith.constant 0 : i32
    return %arg0, %c0_i32 : i32, i32
  }
  func.func @transform_2(%arg0: i32) -> (i32, i32) {
    %c0_i32 = arith.constant 0 : i32
    %c0_i32_0 = arith.constant 0 : i32
    return %arg0, %c0_i32 : i32, i32
  }
  func.func @transform_3(%arg0: i32) -> (i32, i32) {
    %c0_i32 = arith.constant 0 : i32
    %c0_i32_0 = arith.constant 0 : i32
    %c0_i32_1 = arith.constant 0 : i32
    return %c0_i32, %c0_i32_0 : i32, i32
  }
  func.func @transform_4(%arg0: i32) -> (i32, i32) {
    %c0_i32 = arith.constant 0 : i32
    %c0_i32_0 = arith.constant 0 : i32
    %c0_i32_1 = arith.constant 0 : i32
    return %c0_i32, %c0_i32_0 : i32, i32
  }
  func.func @transform_5(%arg0: i32) -> (i32, i32) {
    %c0_i32 = arith.constant 0 : i32
    %c0_i32_0 = arith.constant 0 : i32
    %c0_i32_1 = arith.constant 0 : i32
    return %c0_i32, %c0_i32_0 : i32, i32
  }
  func.func @transform_6(%arg0: i32) -> (i32, i32) {
    %c0_i32 = arith.constant 0 : i32
    %c0_i32_0 = arith.constant 0 : i32
    %c0_i32_1 = arith.constant 0 : i32
    return %c0_i32, %c0_i32_0 : i32, i32
  }
  func.func @transform_7(%arg0: i32) -> (i32, i32) {
    %c0_i32 = arith.constant 0 : i32
    %c0_i32_0 = arith.constant 0 : i32
    %c0_i32_1 = arith.constant 0 : i32
    return %c0_i32, %c0_i32_0 : i32, i32
  }
}

</mosaic_0001>

<bundles_post_ra>
// kernel: tpu_custom_call.1
= control target key start
LH: loop header
LB: loop body
LE: loop exit
PB: predicated region body
PF: predicated region fallthrough
CT: control target
= control target key end

     0   :  { %s1544_s0 = inlined_call_operand.hbm [shape: f32[32,256], index: 0, kind: input, shape index: {}]   ;;  %s1545_s1 = inlined_call_operand.hbm [shape: f32[32,128], index: 1, kind: input, shape index: {}]   ;;  %s1546_s2 = inlined_call_operand.hbm [shape: f32[32,128], index: 2, kind: input, shape index: {}]   ;;  %s1547_s3 = inlined_call_operand.hbm [shape: f32[256,128], index: 3, kind: input, shape index: {}]   ;;  %s1548_s4 = inlined_call_operand.vmem [shape: f32[1,128], index: 4, kind: input, shape index: {}]   ;;  %s1549_s5 = inlined_call_operand.hbm [shape: f32[128,128], index: 5, kind: input, shape index: {}]   ;;  %s1550_s6 = inlined_call_operand.vmem [shape: f32[1,128], index: 6, kind: input, shape index: {}]   ;;  %s1551_s7 = inlined_call_operand.hbm [shape: f32[1,1], index: 7, kind: output, shape index: {}]  }
   0x1   :  { %1559 = sst [smem:[#allocation20_spill]] %s1545_s1 }
   0x2   :  { %1560 = sst [smem:[#allocation21_spill]] %s1547_s3 }
   0x3   :  { %1561 = sst [smem:[#allocation22_spill]] %s1551_s7 }
   0x4   :  { %12 = vsyncpa [#allocation4], 0 }
   0x5   :  { %14 = vsyncpa [#allocation4 + $0x1], 0 }
   0x6   :  { %15 = vsyncpa [#allocation7], 0 }
   0x7   :  { %17 = vsyncpa [#allocation7 + $0x1], 0 }
   0x8   :  { %18 = vsyncpa [#allocation10], 0 }
   0x9   :  { %19 = vsyncpa [#allocation5], 0  ;;  %s1289_s24 = smov 0   ;;  %s1291_s25 = smov 0  }
   0xa   :  { %s1293_s26 = smov 0   ;;  %s1295_s27 = smov 0  }
   0xb LB: > { %1562 = sst [smem:[#allocation17_spill]] %s1235_s26  ;;  %s1308_s28 = sadd.s32 4294967295, %s1239_s27   ;;  %s1239_s27 = sphi %s1295_s27, %s1574_s27   ;;  %s1235_s26 = sphi %s1293_s26, %s1576_s26   ;;  %s1231_s25 = sphi %s1291_s25, %s1578_s25   ;;  %s1227_s24 = sphi %s1289_s24, %s1577_s24  }
   0xc   : > { %p45_p0 = scmp.ne.s32.totalorder %s1231_s25, %s1227_s24  ;;  %p46_p1 = scmp.eq.s32.totalorder %s1308_s28, 0 }
   0xd   : > { %p893_p2 = scmp.ge.s32.totalorder %s1239_s27, 1  ;;  %p213_p3 = scmp.lt.s32.totalorder %s1239_s27, 3 }
   0xe   : > { %p894_p4 = scmp.ne.s32.totalorder %s1308_s28, 0  ;;  %p1317_p5 = por %p46_p1, %p45_p0 }
   0xf   : > { %s1564_s3 = sld [smem:[#allocation21_spill]]  ;;  %p1324_p6 = pnand %p893_p2, %p213_p3 }
  0x10   : > { %s1241_s11 = smov [#allocation9]   ;;  %s1337_s14 = sadd.s32 1, %s1239_s27  }
  0x11   : > { %p943_p7 = pneg %p1324_p6  ;;  %s226_s12 = sshll.u32 %s1241_s11, 4  ;;  %s227_s12 = int_to_ptr.vmem [resolvable:$true] %s226_s12 }
  0x12   : > { %1567 = sst [smem:[#allocation18_spill]] %s1337_s14  ;;  %s1552_s15 = smov 128  }
  0x13   : > { %p1332_p8 = pnand %p943_p7, %p46_p1  ;;  %s1554_s16 = smov 8  }
  0x14   : > { %s29_s17 = ssub.s32 %s1239_s27, %s1337_s14  ;;  %s32_s18 = sadd.s32 1, %s1235_s26 }
  0x15   : > { %s224_s9 = sshll.u32 %s1564_s3, 4  ;;  %p30_p9 = scmp.eq.s32.totalorder %s29_s17, 0  ;;  %s225_s9 = int_to_ptr.hbm [resolvable:$true] %s224_s9 }
  0x16   : > { %946 = dma.hbm_to_vmem [thread:$0]  (!%p1332_p8), %s225_s9, 4096, %s227_s12, [#allocation10], %s1552_s15, %s1552_s15, %s1554_s16  }
  0x17   : > { %p39_p10 = scmp.ne.s32.totalorder %s1235_s26, %s1231_s25  ;;  %p40_p11 = scmp.eq.s32.totalorder %s1239_s27, 0 }
  0x18   : > { %p962_p12 = scmp.lt.s32.totalorder %s1239_s27, 2  ;;  %s1355_s20 = sand.u32 1, %s1235_s26  }
  0x19   : > { %s1352_s19 = scalar_select %p30_p9, %s1235_s26, %s32_s18  }
  0x1a   : > { %p41_p13 = por %p40_p11, %p39_p10  ;;  %s283_s21 = sand.u32 1, %s1239_s27  }
  0x1b   : > { %1568 = sst [smem:[#allocation19_spill]] %s1352_s19  ;;  %s901_s22 = sshll.u32 %s1355_s20, 4 }
  0x1c   : > { %p1359_p0 = pnand %p962_p12, %p41_p13  ;;  %s921_s24 = sshll.u32 %s1239_s27, 4 }
  0x1d   : > { %s1570_s1 = sld [smem:[#allocation20_spill]]  ;;  %s287_s12 = scalar_lea.vmem [#allocation6], %s901_s22 }
  0x1e   : > { %s295_s17 = sshll.u32 %s287_s12, 4  ;;  %s1367_s18 = scalar_lea.sflag [#allocation7], %s283_s21  ;;  %s296_s17 = int_to_ptr.vmem [resolvable:$true] %s295_s17 }
  0x1f   : > { %p1063_p3 = pneg %p1359_p0 }
  0x23   : > { %s292_s9 = scalar_lea.hbm %s1570_s1, %s921_s24  ;;  %s1066_s8 = scalar_lea.hbm %s1570_s1, 32 }
  0x24   : > { %s293_s11 = sshll.u32 %s292_s9, 4  ;;  %s294_s11 = int_to_ptr.hbm [resolvable:$true] %s293_s11 }
  0x25   : > { %s1059_s15 = sshra.s32 %s294_s11, 4  ;;  %s1060_s15 = int_to_ptr.hbm [resolvable:$true] %s1059_s15 }
  0x26   : > { %s1061_s16 = scalar_lea.hbm %s1060_s15, 16  ;;  %p1067_p10 = scmp.lt.s32.totalorder %s1060_s15, %s1570_s1 }
  0x27   : > { %p1062_p2 = scmp.ne.s32.totalorder %s1060_s15, %s1061_s16  ;;  %p1068_p11 = scmp.lt.s32.totalorder %s1066_s8, %s1061_s16 }
  0x29   : > { %p1064_p7 = pnand %p1063_p3, %p1062_p2  ;;  %p1069_p12 = por %p1068_p11, %p1067_p10 }
  0x2b   : > { %p1065_p9 = pneg %p1064_p7 }
  0x2d   : > { %p1070_p13 = pnand %p1069_p12, %p1065_p9 }
  0x2f   : > { %1073 = shalt.err (!%p1070_p13)
}
  0x30   : > { %s1571_s21 = smov 8   ;;  %s1572_s19 = smov 128  }
  0x31   : > { %956 = dma.hbm_to_vmem [thread:$0]  (!%p1359_p0), %s294_s11, 256, %s296_s17, %s1367_s18, %s1572_s19, %s1572_s19, %s1571_s21  }
  0x32   : > { %s314_s26 = scalar_lea.hbm %s1546_s2, %s921_s24  ;;  %s309_s15 = scalar_lea.vmem [#allocation8], %s901_s22 }
  0x33   : > { %s315_s9 = sshll.u32 %s314_s26, 4  ;;  %s317_s16 = sshll.u32 %s309_s15, 4  ;;  %s1389_s9 = int_to_ptr.hbm [resolvable:$true] %s315_s9  ;;  %s1391_s16 = int_to_ptr.vmem [resolvable:$true] %s317_s16 }
  0x34   : > { %s241_s1 = sshll.u32 %s1549_s5, 4  ;;  %s1244_s14 = smov [#allocation11]   ;;  %s242_s1 = int_to_ptr.hbm [resolvable:$true] %s241_s1 }
  0x35   : > { %s243_s7 = sshll.u32 %s1244_s14, 4  ;;  %s897_s26 = sshll.u32 %s1355_s20, 5  ;;  %s244_s7 = int_to_ptr.vmem [resolvable:$true] %s243_s7 }
  0x36   : > { %949 = dma.hbm_to_vmem [thread:$0]  (!%p1332_p8), %s242_s1, 2048, %s244_s7, [#allocation10], %s1572_s19, %s1572_s19, %s1571_s21  }
  0x37   : > { %s920_s22 = sshll.u32 %s1239_s27, 5  ;;  %s264_s30 = scalar_lea.vmem [#allocation3], %s897_s26 }
  0x38   : > { %s270_s17 = scalar_lea.hbm %s1544_s0, %s920_s22  ;;  %s273_s15 = sshll.u32 %s264_s30, 4  ;;  %s274_s15 = int_to_ptr.vmem [resolvable:$true] %s273_s15 }
  0x39   : > { %s271_s3 = sshll.u32 %s270_s17, 4  ;;  %s261_s8 = scalar_lea.sflag [#allocation4], %s1355_s20  ;;  %s272_s3 = int_to_ptr.hbm [resolvable:$true] %s271_s3 }
  0x3a   : > { %s1119_s14 = sshra.s32 %s272_s3, 4  ;;  %s1126_s27 = scalar_lea.hbm %s1544_s0, 64  ;;  %s1120_s14 = int_to_ptr.hbm [resolvable:$true] %s1119_s14 }
  0x3b   : > { %s1121_s12 = scalar_lea.hbm %s1120_s14, 32  ;;  %p1127_p9 = scmp.lt.s32.totalorder %s1120_s14, %s1544_s0 }
  0x3c   : > { %p1122_p2 = scmp.ne.s32.totalorder %s1120_s14, %s1121_s12  ;;  %p1128_p10 = scmp.lt.s32.totalorder %s1126_s27, %s1121_s12 }
  0x3e   : > { %p1124_p7 = pnand %p1122_p2, %p1063_p3  ;;  %p1129_p11 = por %p1128_p10, %p1127_p9 }
  0x40   : > { %p1125_p8 = pneg %p1124_p7 }
  0x42   : > { %p1130_p12 = pnand %p1129_p11, %p1125_p8 }
  0x44   : > { %1133 = shalt.err (!%p1130_p12)
}
  0x45   : > { %s1245_s20 = smov 256   ;;  %s1246_s26 = smov 16  }
  0x46   : > { %953 = dma.hbm_to_vmem [thread:$0]  (!%p1359_p0), %s272_s3, 512, %s274_s15, %s261_s8, %s1245_s20, %s1245_s20, %s1246_s26  }
  0x47   : > { %s1149_s24 = sshra.s32 %s1389_s9, 4  ;;  %s1156_s14 = scalar_lea.hbm %s1546_s2, 32  ;;  %s1150_s24 = int_to_ptr.hbm [resolvable:$true] %s1149_s24 }
  0x48   : > { %s1151_s11 = scalar_lea.hbm %s1150_s24, 16  ;;  %p1157_p8 = scmp.lt.s32.totalorder %s1150_s24, %s1546_s2 }
  0x49   : > { %p1152_p13 = scmp.ne.s32.totalorder %s1150_s24, %s1151_s11  ;;  %p1158_p9 = scmp.lt.s32.totalorder %s1156_s14, %s1151_s11 }
  0x4b   : > { %p1154_p2 = pnand %p1152_p13, %p1063_p3  ;;  %p1159_p10 = por %p1158_p9, %p1157_p8 }
  0x4d   : > { %p1155_p7 = pneg %p1154_p2 }
  0x4f   : > { %p1160_p11 = pnand %p1159_p10, %p1155_p7 }
  0x51   : > { %1163 = shalt.err (!%p1160_p11)
}
  0x52   : > { %959 = dma.hbm_to_vmem [thread:$0]  (!%p1359_p0), %s1389_s9, 256, %s1391_s16, %s1367_s18, %s1572_s19, %s1572_s19, %s1571_s21  }
  0x53   : > { %329 = sbr.rel (%p1324_p6) target bundleno = 749 (0x2ed), region = 48  ;;  %s331_s3 = sand.u32 (!%p1324_p6), 1, %s1231_s25  }
  0x54   : > { %s908_s15 = sshll.u32 (!%p1324_p6), %s331_s3, 5  ;;  %s332_s8 = scalar_lea.sflag (!%p1324_p6), [#allocation4], %s331_s3 }
  0x55   : > { %s335_s7 = scalar_lea.vmem (!%p1324_p6), [#allocation3], %s908_s15 }
  0x58   : > { %1210 = dma.done.wait (%p1317_p5), %s332_s8, 512  }
  0x59   : > { %1212 = vsyncadd (%p1317_p5), %s332_s8, 4294966784  ;;  %s341_s23 = sand.u32 1, %s1308_s28   ;;  %s909_s27 = sshll.u32 %s331_s3, 4 }
  0x5a   : > { %s342_s13 = scalar_lea.sflag [#allocation7], %s341_s23  ;;  %s1444_s19 = scalar_lea.vmem [#allocation6], %s909_s27 }
  0x5b   : > { %1214 = dma.done.wait (%p1317_p5), %s342_s13, 512  }
  0x5c   : > { %1216 = vsyncadd (%p1317_p5), %s342_s13, 4294966784  ;;  %s355_s10 = scalar_lea.vmem [#allocation8], %s909_s27 }
  0x5d   : > { %1218 = dma.done.wait (%p46_p1), [#allocation10], 6144  }
  0x5e   : > { %1220 = vsyncadd (%p46_p1), [#allocation10], 4294961152  ;;  %408 = sbr.rel (%p894_p4) target bundleno = 102 (0x66), region = 72 }
  0x63   : > { %vm409_vm0 = vcmask 7168   ;;  %v1247_v0 = vmov 0.0  }
  0x64   : > { %410 = vst.msk [vmem:[#allocation2] sm:$0xff] %vm409_vm0, %v1247_v0 }
  0x65   : > { %411 = vst.msk [vmem:[#allocation2 + $0x8] sm:$0xff] %vm409_vm0, %v1247_v0 }
  0x66 PF: > { %v1456_v1 = vld [vmem:[%s355_s10 + $0x8] sm:$0xff]  ;;  %v1459_v2 = vld [vmem:[%s1444_s19] sm:$0xff]  ;;  %p914_p1 = scmp.ne.s32.totalorder %s1308_s28, 1 }
  0x67   : > { %v1461_v3 = vld [vmem:[%s335_s7] sm:$0xff]  ;;  %v487_v4 = vmul.f32 %v1456_v1, %v1456_v1  ;;  %v454_v5 = vmul.f32 %v1459_v2, %v1459_v2  ;;  %v1467_v6 = vld [vmem:[%s335_s7 + $0x8] sm:$0xff]  ;;  %v1471_v8 = vld [vmem:[%s335_s7 + $0x10] sm:$0xff] }
  0x68   : > { %v416_v7 = vmul.f32 %v1461_v3, %v1461_v3  ;;  %v417_v9 = vmul.f32 %v1467_v6, %v1467_v6  ;;  %v1475_v10 = vld [vmem:[%s335_s7 + $0x18] sm:$0xff]  ;;  %v418_v12 = vmul.f32 %v1471_v8, %v1471_v8  ;;  %v614_v16 = vld [vmem:[#allocation11 + $0x70] sm:$0xff]  ;;  %v613_v21 = vld [vmem:[#allocation11 + $0x68] sm:$0xff] }
  0x69   : > { %v615_v11 = vld [vmem:[#allocation11 + $0x78] sm:$0xff]  ;;  %490 = vadd.xlane.f32.xlu2 %v487_v4  ;;  %456 = vadd.xlane.f32.xlu0 %v454_v5  ;;  %v419_v13 = vmul.f32 %v1475_v10, %v1475_v10  ;;  %v1481_v18 = vld [vmem:[%s355_s10] sm:$0xff]  ;;  %v529_v23 = vld [vmem:[#allocation9 + $0x68] sm:$0xff] }
  0x6a   : > { %v531_v14 = vld [vmem:[#allocation9 + $0x78] sm:$0xff]  ;;  %v420_v17 = vadd.f32 %v417_v9, %v416_v7  ;;  %620 = vmatpush.msra.mxu2 %v615_v11  ;;  %v530_v19 = vld [vmem:[#allocation9 + $0x70] sm:$0xff]  ;;  %645 = vmatpush.msra.mxu3 %v615_v11  ;;  %v545_v24 = vld [vmem:[#allocation9 + $0xe8] sm:$0xff]  ;;  %v486_v25 = vmul.f32 %v1481_v18, %v1481_v18 }
  0x6b   : > { %v547_v15 = vld [vmem:[#allocation9 + $0xf8] sm:$0xff]  ;;  %552 = vmatpush.msra.mxu0 %v531_v14  ;;  %v546_v20 = vld [vmem:[#allocation9 + $0xf0] sm:$0xff]  ;;  %v423_v26 = vadd.f32 %v419_v13, %v418_v12  ;;  %v612_v27 = vld [vmem:[#allocation11 + $0x60] sm:$0xff] }
  0x6c   : > { %575 = vmatpush.msra.mxu1 %v547_v15  ;;  %421 = vadd.xlane.f32.xlu1 %v420_v17  ;;  %v1484_v22 = vld [vmem:[%s1444_s19 + $0x8] sm:$0xff]  ;;  %v528_v28 = vld [vmem:[#allocation9 + $0x60] sm:$0xff]  ;;  %v610_v34 = vld [vmem:[#allocation11 + $0x50] sm:$0xff] }
  0x6d   : > { %621 = vmatpush.msra.mxu2 %v614_v16  ;;  %553 = vmatpush.msra.mxu0 %v530_v19  ;;  %v544_v29 = vld [vmem:[#allocation9 + $0xe0] sm:$0xff]  ;;  %v455_v30 = vmul.f32 %v1484_v22, %v1484_v22  ;;  %v611_v31 = vld [vmem:[#allocation11 + $0x58] sm:$0xff]  ;;  %v526_v35 = vld [vmem:[#allocation9 + $0x50] sm:$0xff] }
  0x6e   : > { %576 = vmatpush.msra.mxu1 %v546_v20  ;;  %646 = vmatpush.msra.mxu3 %v614_v16  ;;  %v527_v32 = vld [vmem:[#allocation9 + $0x58] sm:$0xff]  ;;  %v542_v36 = vld [vmem:[#allocation9 + $0xd0] sm:$0xff]  ;;  %v609_v37 = vld [vmem:[#allocation11 + $0x48] sm:$0xff] }
  0x6f   : > { %622 = vmatpush.msra.mxu2 %v613_v21  ;;  %554 = vmatpush.msra.mxu0 %v529_v23  ;;  %v543_v33 = vld [vmem:[#allocation9 + $0xd8] sm:$0xff]  ;;  %v525_v38 = vld [vmem:[#allocation9 + $0x48] sm:$0xff]  ;;  %v608_v40 = vld [vmem:[#allocation11 + $0x40] sm:$0xff] }
  0x70   : > { %577 = vmatpush.msra.mxu1 %v545_v24  ;;  %647 = vmatpush.msra.mxu3 %v613_v21  ;;  %v541_v39 = vld [vmem:[#allocation9 + $0xc8] sm:$0xff]  ;;  %v524_v41 = vld [vmem:[#allocation9 + $0x40] sm:$0xff]  ;;  %v607_v43 = vld [vmem:[#allocation11 + $0x38] sm:$0xff] }
  0x71   : > { %623 = vmatpush.msra.mxu2 %v612_v27  ;;  %488 = vadd.xlane.f32.xlu0 %v486_v25  ;;  %v540_v42 = vld [vmem:[#allocation9 + $0xc0] sm:$0xff]  ;;  %v523_v44 = vld [vmem:[#allocation9 + $0x38] sm:$0xff]  ;;  %v606_v46 = vld [vmem:[#allocation11 + $0x30] sm:$0xff] }
  0x72   : > { %424 = vadd.xlane.f32.xlu2 %v423_v26  ;;  %555 = vmatpush.msra.mxu0 %v528_v28  ;;  %v539_v45 = vld [vmem:[#allocation9 + $0xb8] sm:$0xff]  ;;  %v522_v47 = vld [vmem:[#allocation9 + $0x30] sm:$0xff]  ;;  %v605_v49 = vld [vmem:[#allocation11 + $0x28] sm:$0xff] }
  0x73   : > { %578 = vmatpush.msra.mxu1 %v544_v29  ;;  %624 = vmatpush.msra.mxu2 %v611_v31  ;;  %v538_v48 = vld [vmem:[#allocation9 + $0xb0] sm:$0xff]  ;;  %v521_v50 = vld [vmem:[#allocation9 + $0x28] sm:$0xff]  ;;  %v604_v52 = vld [vmem:[#allocation11 + $0x20] sm:$0xff] }
  0x74   : > { %648 = vmatpush.msra.mxu3 %v612_v27  ;;  %458 = vadd.xlane.f32.xlu1 %v455_v30  ;;  %v537_v51 = vld [vmem:[#allocation9 + $0xa8] sm:$0xff]  ;;  %v520_v53 = vld [vmem:[#allocation9 + $0x20] sm:$0xff]  ;;  %v603_v55 = vld [vmem:[#allocation11 + $0x18] sm:$0xff] }
  0x75   : > { %556 = vmatpush.msra.mxu0 %v527_v32  ;;  %579 = vmatpush.msra.mxu1 %v543_v33  ;;  %v536_v54 = vld [vmem:[#allocation9 + $0xa0] sm:$0xff]  ;;  %v519_v56 = vld [vmem:[#allocation9 + $0x18] sm:$0xff]  ;;  %v602_v58 = vld [vmem:[#allocation11 + $0x10] sm:$0xff] }
  0x76   : > { %649 = vmatpush.msra.mxu3 %v611_v31  ;;  %625 = vmatpush.msra.mxu2 %v610_v34  ;;  %v535_v57 = vld [vmem:[#allocation9 + $0x98] sm:$0xff]  ;;  %v518_v59 = vld [vmem:[#allocation9 + $0x10] sm:$0xff]  ;;  %v601_v61 = vld [vmem:[#allocation11 + $0x8] sm:$0xff] }
  0x77   : > { %557 = vmatpush.msra.mxu0 %v526_v35  ;;  %580 = vmatpush.msra.mxu1 %v542_v36  ;;  %v534_v60 = vld [vmem:[#allocation9 + $0x90] sm:$0xff]  ;;  %v517_v62 = vld [vmem:[#allocation9 + $0x8] sm:$0xff]  ;;  %v600_v0 = vld [vmem:[#allocation11] sm:$0xff] }
  0x78   : > { %650 = vmatpush.msra.mxu3 %v610_v34  ;;  %626 = vmatpush.msra.mxu2 %v609_v37  ;;  %v533_v63 = vld [vmem:[#allocation9 + $0x88] sm:$0xff]  ;;  %v516_v4 = vld [vmem:[#allocation9] sm:$0xff] }
  0x79   : > { %558 = vmatpush.msra.mxu0 %v525_v38  ;;  %581 = vmatpush.msra.mxu1 %v541_v39  ;;  %v532_v5 = vld [vmem:[#allocation9 + $0x80] sm:$0xff] }
  0x7a   : > { %651 = vmatpush.msra.mxu3 %v609_v37  ;;  %627 = vmatpush.msra.mxu2 %v608_v40 }
  0x7b   : > { %559 = vmatpush.msra.mxu0 %v524_v41  ;;  %582 = vmatpush.msra.mxu1 %v540_v42 }
  0x7c   : > { %652 = vmatpush.msra.mxu3 %v608_v40  ;;  %628 = vmatpush.msra.mxu2 %v607_v43 }
  0x7d   : > { %560 = vmatpush.msra.mxu0 %v523_v44  ;;  %583 = vmatpush.msra.mxu1 %v539_v45 }
  0x7e   : > { %653 = vmatpush.msra.mxu3 %v607_v43  ;;  %629 = vmatpush.msra.mxu2 %v606_v46 }
  0x7f   : > { %561 = vmatpush.msra.mxu0 %v522_v47  ;;  %584 = vmatpush.msra.mxu1 %v538_v48 }
  0x80   : > { %654 = vmatpush.msra.mxu3 %v606_v46  ;;  %630 = vmatpush.msra.mxu2 %v605_v49 }
  0x81   : > { %562 = vmatpush.msra.mxu0 %v521_v50  ;;  %585 = vmatpush.msra.mxu1 %v537_v51 }
  0x82   : > { %655 = vmatpush.msra.mxu3 %v605_v49  ;;  %631 = vmatpush.msra.mxu2 %v604_v52 }
  0x83   : > { %563 = vmatpush.msra.mxu0 %v520_v53  ;;  %586 = vmatpush.msra.mxu1 %v536_v54 }
  0x84   : > { %656 = vmatpush.msra.mxu3 %v604_v52  ;;  %632 = vmatpush.msra.mxu2 %v603_v55 }
  0x85   : > { %564 = vmatpush.msra.mxu0 %v519_v56  ;;  %587 = vmatpush.msra.mxu1 %v535_v57 }
  0x86   : > { %657 = vmatpush.msra.mxu3 %v603_v55  ;;  %633 = vmatpush.msra.mxu2 %v602_v58 }
  0x87   : > { %565 = vmatpush.msra.mxu0 %v518_v59  ;;  %588 = vmatpush.msra.mxu1 %v534_v60 }
  0x88   : > { %658 = vmatpush.msra.mxu3 %v602_v58  ;;  %634 = vmatpush.msra.mxu2 %v601_v61 }
  0x89   : > { %566 = vmatpush.msra.mxu0 %v517_v62  ;;  %589 = vmatpush.msra.mxu1 %v533_v63 }
  0x8a   : > { %659 = vmatpush.msra.mxu3 %v601_v61  ;;  %635 = vmatpush.msra.mxu2 %v600_v0 }
  0x8b   : > { %567 = vmatpush.msra.mxu0 %v516_v4  ;;  %590 = vmatpush.msra.mxu1 %v532_v5 }
  0x8c   : > { %660 = vmatpush.msra.mxu3 %v600_v0 }
  0xdc   : > { %v491_v7 = vpop.xlane.xlu2 %490  ;;  %v457_v9 = vpop.xlane.xlu0 %456 }
  0xdd   : > { %v1490_v11 = vmax.f32 %v491_v7, 1e-24  ;;  %v460_v12 = vmax.f32 %v457_v9, 1e-24 }
  0xdf   : > { %v422_v13 = vpop.xlane.xlu1 %421  ;;  %1009 = vrsqrt.f32 %v460_v12  ;;  %vm468_vm2 = vweird.f32 %v460_v12  ;;  %vm510_vm15 = vweird.f32 %v1490_v11 }
  0xe0   : > { %v426_v14 = vmax.f32 %v422_v13, 1e-24  ;;  %1011 = vrsqrt.f32 %v1490_v11 }
  0xe2   : > { %1013 = vrsqrt.f32 %v426_v14  ;;  %vm434_vm3 = vweird.f32 %v426_v14 }
  0xe4   : > { %v489_v15 = vpop.xlane.xlu0 %488 }
  0xe5   : > { %v425_v16 = vpop.xlane.xlu2 %424  ;;  %v492_v17 = vmax.f32 %v489_v15, 1e-24  ;;  %v1010_v20 = vpop.eup %1009 }
  0xe6   : > { %v1493_v19 = vmax.f32 %v425_v16, 1e-24  ;;  %v1495_v21 = vpop.eup %1011  ;;  %v463_v23 = vmul.f32 %v1010_v20, %v460_v12  ;;  %vm469_vm1 = vweird.f32 %v1010_v20 }
  0xe7   : > { %1015 = vrsqrt.f32 %v492_v17  ;;  %v459_v24 = vpop.xlane.xlu1 %458  ;;  %v505_v29 = vmul.f32 %v1495_v21, %v1490_v11  ;;  %vm470_vm5 = vmor %vm468_vm2, %vm469_vm1  ;;  %vm500_vm10 = vweird.f32 %v492_v17  ;;  %vm511_vm1 = vweird.f32 %v1495_v21  ;;  %v1007_v11 = vld [vmem:[%s1548_s4] ss:$0 sm:$0xff] }
  0xe8   : > { %v1014_v25 = vpop.eup %1013  ;;  %1017 = vrsqrt.f32 %v1493_v19  ;;  %v461_v26 = vmax.f32 %v459_v24, 1e-24  ;;  %v464_v27 = vmul.f32 %v1010_v20, %v463_v23  ;;  %vm444_vm8 = vweird.f32 %v1493_v19  ;;  %vm512_vm2 = vmor %vm510_vm15, %vm511_vm1 }
  0xe9   : > { %v429_v28 = vmul.f32 %v1014_v25, %v426_v14  ;;  %v506_v36 = vmul.f32 %v1495_v21, %v505_v29  ;;  %vm435_vm4 = vweird.f32 %v1014_v25 }
  0xea   : > { %1019 = vrsqrt.f32 %v461_v26  ;;  %v465_v30 = vmul.f32 0.5, %v464_v27  ;;  %vm436_vm6 = vmor %vm434_vm3, %vm435_vm4  ;;  %vm478_vm11 = vweird.f32 %v461_v26 }
  0xeb   : > { %v430_v31 = vmul.f32 %v1014_v25, %v429_v28  ;;  %v507_v47 = vmul.f32 0.5, %v506_v36 }
  0xec   : > { %v466_v33 = vsub.f32 1.5, %v465_v30 }
  0xed   : > { %v1016_v32 = vpop.eup %1015  ;;  %v431_v34 = vmul.f32 0.5, %v430_v31  ;;  %v508_v58 = vsub.f32 1.5, %v507_v47 }
  0xee   : > { %v1018_v35 = vpop.eup %1017  ;;  %v495_v37 = vmul.f32 %v1016_v32, %v492_v17  ;;  %v467_v40 = vmul.f32 %v1010_v20, %v466_v33  ;;  %vm501_vm7 = vweird.f32 %v1016_v32 }
  0xef   : > { %v432_v38 = vsub.f32 1.5, %v431_v34  ;;  %v439_v39 = vmul.f32 %v1018_v35, %v1493_v19  ;;  %vm445_vm9 = vweird.f32 %v1018_v35  ;;  %vm502_vm12 = vmor %vm500_vm10, %vm501_vm7  ;;  %v509_v63 = vmul.f32 %v1495_v21, %v508_v58 }
  0xf0   : > { %v1020_v41 = vpop.eup %1019  ;;  %v496_v42 = vmul.f32 %v1016_v32, %v495_v37  ;;  %v471_v45 = vsel %vm470_vm5, %v1010_v20, %v467_v40  ;;  %vm446_vm14 = vmor %vm444_vm8, %vm445_vm9  ;;  %vm748_vm8 = vcmask 7168  }
  0xf1   : > { %v440_v43 = vmul.f32 %v1018_v35, %v439_v39  ;;  %v473_v44 = vmul.f32 %v1020_v41, %v461_v26  ;;  %v433_v46 = vmul.f32 %v1014_v25, %v432_v38  ;;  %v482_v49 = vmul.f32 %v471_v45, %v1459_v2 }
  0xf2   : > { %v497_v48 = vmul.f32 0.5, %v496_v42  ;;  %vm479_vm13 = vweird.f32 %v1020_v41 }
  0xf3   : > { %v441_v50 = vmul.f32 0.5, %v440_v43  ;;  %v474_v51 = vmul.f32 %v1020_v41, %v473_v44  ;;  %v437_v52 = vsel %vm436_vm6, %v1014_v25, %v433_v46  ;;  %636 = vmatmul.f32.vlgmr.msra.gmra.mxu2 %v482_v49  ;;  %vm480_vm0 = vmor %vm478_vm11, %vm479_vm13 }
  0xf4   : > { %v498_v53 = vsub.f32 1.5, %v497_v48  ;;  %v448_v54 = vmul.f32 %v437_v52, %v1461_v3  ;;  %v449_v55 = vmul.f32 %v437_v52, %v1467_v6 }
  0xf5   : > { %v442_v56 = vsub.f32 1.5, %v441_v50  ;;  %v475_v57 = vmul.f32 0.5, %v474_v51 }
  0xf6   : > { %568 = vmatmul.f32.vlgmr.msra.gmra.mxu0 %v448_v54  ;;  %591 = vmatmul.f32.vlgmr.msra.gmra.mxu1 %v449_v55  ;;  %v499_v2 = vmul.f32 %v1016_v32, %v498_v53 }
  0xf7   : > { %v476_v59 = vsub.f32 1.5, %v475_v57  ;;  %v443_v60 = vmul.f32 %v1018_v35, %v442_v56 }
  0xf8   : > { %v503_v61 = vsel %vm502_vm12, %v1016_v32, %v499_v2 }
  0xf9   : > { %v514_v3 = vmul.f32 %v503_v61, %v1481_v18  ;;  %v447_v6 = vsel %vm446_vm14, %v1018_v35, %v443_v60  ;;  %v477_v62 = vmul.f32 %v1020_v41, %v476_v59  ;;  %v513_v18 = vsel %vm512_vm2, %v1495_v21, %v509_v63 }
  0xfa   : > { %v450_v4 = vmul.f32 %v447_v6, %v1471_v8  ;;  %v451_v5 = vmul.f32 %v447_v6, %v1475_v10  ;;  %v515_v9 = vmul.f32 %v513_v18, %v1456_v1  ;;  %v1008_v8 = vld [vmem:[%s1550_s6] ss:$0 sm:$0xff] }
  0xfb   : > { %661 = vmatmul.f32.vlgmr.msra.gmra.mxu3 %v514_v3  ;;  %v481_v0 = vsel %vm480_vm0, %v1020_v41, %v477_v62 }
  0xfc   : > { %v483_v7 = vmul.f32 %v481_v0, %v1484_v22 }
  0xfe   : > { %571 = vmatmul.f32.gmra.mxu0 %v450_v4  ;;  %594 = vmatmul.f32.gmra.mxu1 %v451_v5 }
  0xff   : > { %639 = vmatmul.f32.gmra.mxu2 %v483_v7 }
 0x103   : > { %664 = vmatmul.f32.gmra.mxu3 %v515_v9 }
 0x173   : > { %v569_v12 = vpop.f32.mrf.mxu0  ;;  %v592_v10 = vpop.f32.mrf.mxu1 }
 0x174   : > { %v570_v13 = vadd.f32 %v1007_v11, %v569_v12 }
 0x176   : > { %v593_v22 = vadd.f32 %v592_v10, %v570_v13  ;;  %v637_v14 = vpop.f32.mrf.mxu2 }
 0x177   : > { %v638_v15 = vadd.f32 %v1008_v8, %v637_v14 }
 0x178   : > { %v598_v16 = vmax.f32 %v593_v22, 0.0 }
 0x179   : > { %v643_v17 = vmax.f32 %v638_v15, 0.0 }
 0x17b   : > { %v572_v19 = vpop.f32.mrf.mxu0  ;;  %v670_v20 = vsub.f32 %v598_v16, %v643_v17  ;;  %v595_v25 = vpop.f32.mrf.mxu1 }
 0x17c   : > { %v573_v1 = vadd.f32 %v1007_v11, %v572_v19 }
 0x17d   : > { %v672_v23 = vadd.f32 1e-06, %v670_v20  ;;  %v744_v20 = vld [vmem:[#allocation2] sm:$0xff] }
 0x17e   : > { %v662_v21 = vpop.f32.mrf.mxu3  ;;  %v596_v27 = vadd.f32 %v595_v25, %v573_v1 }
 0x17f   : > { %v663_v24 = vadd.f32 %v1008_v8, %v662_v21  ;;  %v674_v26 = vmul.f32 %v672_v23, %v672_v23 }
 0x180   : > { %v599_v32 = vmax.f32 %v596_v27, 0.0 }
 0x181   : > { %v668_v28 = vmax.f32 %v663_v24, 0.0  ;;  %676 = vadd.xlane.f32.xlu0 %v674_v26 }
 0x182   : > { %v640_v29 = vpop.f32.mrf.mxu2 }
 0x183   : > { %v641_v30 = vadd.f32 %v1008_v8, %v640_v29  ;;  %v704_v31 = vsub.f32 %v598_v16, %v668_v28 }
 0x185   : > { %v644_v33 = vmax.f32 %v641_v30, 0.0  ;;  %v706_v34 = vadd.f32 1e-06, %v704_v31 }
 0x186   : > { %v665_v35 = vpop.f32.mrf.mxu3 }
 0x187   : > { %v666_v36 = vadd.f32 %v1008_v8, %v665_v35  ;;  %v708_v37 = vmul.f32 %v706_v34, %v706_v34  ;;  %v671_v38 = vsub.f32 %v599_v32, %v644_v33 }
 0x189   : > { %v669_v39 = vmax.f32 %v666_v36, 0.0  ;;  %710 = vadd.xlane.f32.xlu2 %v708_v37  ;;  %v673_v40 = vadd.f32 1e-06, %v671_v38 }
 0x18b   : > { %v675_v41 = vmul.f32 %v673_v40, %v673_v40  ;;  %v705_v42 = vsub.f32 %v599_v32, %v669_v39  ;;  %v745_v32 = vld [vmem:[#allocation2 + $0x8] sm:$0xff] }
 0x18d   : > { %678 = vadd.xlane.f32.xlu1 %v675_v41  ;;  %v707_v43 = vadd.f32 1e-06, %v705_v42 }
 0x18f   : > { %v709_v44 = vmul.f32 %v707_v43, %v707_v43 }
 0x191   : > { %712 = vadd.xlane.f32.xlu0 %v709_v44 }
 0x1f4   : > { %v677_v45 = vpop.xlane.xlu0 %676 }
 0x1f5   : > { %1021 = vrsqrt.f32 %v677_v45  ;;  %vm687_vm3 = vcmp.eq.f32.partialorder %v677_v45, inf  ;;  %vm689_vm4 = vcmp.eq.f32.partialorder %v677_v45, 0.0  ;;  %v690_v9 = vand.u32 2147483648, %v677_v45 }
 0x1fb   : > { %v1022_v46 = vpop.eup %1021 }
 0x1fc   : > { %v711_v47 = vpop.xlane.xlu2 %710  ;;  %v681_v48 = vmul.f32 %v1022_v46, %v677_v45 }
 0x1fd   : > { %1023 = vrsqrt.f32 %v711_v47  ;;  %vm721_vm5 = vcmp.eq.f32.partialorder %v711_v47, inf  ;;  %v724_v11 = vand.u32 2147483648, %v711_v47  ;;  %vm723_vm6 = vcmp.eq.f32.partialorder %v711_v47, 0.0 }
 0x1fe   : > { %v682_v49 = vmul.f32 %v1022_v46, %v681_v48 }
 0x200   : > { %v679_v50 = vpop.xlane.xlu1 %678  ;;  %v683_v51 = vmul.f32 0.5, %v682_v49 }
 0x201   : > { %1025 = vrsqrt.f32 %v679_v50  ;;  %vm699_vm7 = vcmp.eq.f32.partialorder %v679_v50, inf  ;;  %v702_v24 = vand.u32 2147483648, %v679_v50  ;;  %vm701_vm10 = vcmp.eq.f32.partialorder %v679_v50, 0.0 }
 0x202   : > { %v684_v53 = vsub.f32 1.5, %v683_v51 }
 0x203   : > { %v1024_v52 = vpop.eup %1023 }
 0x204   : > { %v715_v54 = vmul.f32 %v1024_v52, %v711_v47  ;;  %v713_v55 = vpop.xlane.xlu0 %712  ;;  %v685_v56 = vmul.f32 %v1022_v46, %v684_v53 }
 0x205   : > { %1027 = vrsqrt.f32 %v713_v55  ;;  %vm733_vm9 = vcmp.eq.f32.partialorder %v713_v55, inf  ;;  %v736_v25 = vand.u32 2147483648, %v713_v55  ;;  %vm735_vm11 = vcmp.eq.f32.partialorder %v713_v55, 0.0 }
 0x206   : > { %v716_v57 = vmul.f32 %v1024_v52, %v715_v54  ;;  %v686_v60 = vmul.f32 %v685_v56, %v677_v45 }
 0x207   : > { %v1026_v58 = vpop.eup %1025 }
 0x208   : > { %v717_v2 = vmul.f32 0.5, %v716_v57  ;;  %v693_v59 = vmul.f32 %v1026_v58, %v679_v50  ;;  %v688_v4 = vsel %vm687_vm3, %v677_v45, %v686_v60 }
 0x209   : > { %v691_v10 = vsel %vm689_vm4, %v690_v9, %v688_v4 }
 0x20a   : > { %v718_v61 = vsub.f32 1.5, %v717_v2  ;;  %v694_v3 = vmul.f32 %v1026_v58, %v693_v59 }
 0x20b   : > { %v1028_v6 = vpop.eup %1027 }
 0x20c   : > { %v719_v62 = vmul.f32 %v1024_v52, %v718_v61  ;;  %v695_v63 = vmul.f32 0.5, %v694_v3  ;;  %v727_v0 = vmul.f32 %v1028_v6, %v713_v55 }
 0x20e   : > { %v720_v5 = vmul.f32 %v719_v62, %v711_v47  ;;  %v696_v7 = vsub.f32 1.5, %v695_v63  ;;  %v728_v18 = vmul.f32 %v1028_v6, %v727_v0 }
 0x210   : > { %v722_v12 = vsel %vm721_vm5, %v711_v47, %v720_v5  ;;  %v697_v13 = vmul.f32 %v1026_v58, %v696_v7  ;;  %v729_v8 = vmul.f32 0.5, %v728_v18 }
 0x211   : > { %v725_v22 = vsel %vm723_vm6, %v724_v11, %v722_v12 }
 0x212   : > { %v738_v14 = vsub.f32 %v691_v10, %v725_v22  ;;  %v698_v15 = vmul.f32 %v697_v13, %v679_v50  ;;  %v730_v16 = vsub.f32 1.5, %v729_v8 }
 0x214   : > { %v740_v17 = vadd.f32 0.1, %v738_v14  ;;  %v731_v19 = vmul.f32 %v1028_v6, %v730_v16  ;;  %v700_v21 = vsel %vm699_vm7, %v679_v50, %v698_v15 }
 0x215   : > { %v703_v28 = vsel %vm701_vm10, %v702_v24, %v700_v21 }
 0x216   : > { %v742_v1 = vmax.f32 %v740_v17, 0.0  ;;  %v732_v23 = vmul.f32 %v731_v19, %v713_v55 }
 0x218   : > { %v746_v26 = vadd.f32 %v744_v20, %v742_v1  ;;  %v734_v27 = vsel %vm733_vm9, %v713_v55, %v732_v23 }
 0x219   : > { %v737_v29 = vsel %vm735_vm11, %v736_v25, %v734_v27 }
 0x21a   : > { %749 = vst.msk [vmem:[#allocation2] sm:$0xff] %vm748_vm8, %v746_v26  ;;  %v739_v30 = vsub.f32 %v703_v28, %v737_v29 }
 0x21c   : > { %v741_v31 = vadd.f32 0.1, %v739_v30 }
 0x21e   : > { %v743_v33 = vmax.f32 %v741_v31, 0.0  ;;  %754 = sbr.rel (%p914_p1) target bundleno = 738 (0x2e2), region = 76 }
 0x220   : > { %v747_v34 = vadd.f32 %v745_v32, %v743_v33 }
 0x222   : > { %750 = vst.msk [vmem:[#allocation2 + $0x8] sm:$0xff] %vm748_vm8, %v747_v34 }
 0x223   : > { %v755_v35 = vld [vmem:[#allocation2] sm:$0xff] }
 0x224   : > { %v757_v37 = vsel %vm748_vm8, %v755_v35, 0.0 }
 0x229   : > { %v756_v36 = vld [vmem:[#allocation2 + $0x8] sm:$0xff] }
 0x22a   : > { %v758_v38 = vsel %vm748_vm8, %v756_v36, 0.0 }
 0x22b   : > { %v759_v39 = vadd.f32 %v758_v38, %v757_v37 }
 0x22d   : > { %760 = vadd.xlane.f32.xlu0 %v759_v39 }
 0x2a0   : > { %v761_v40 = vpop.xlane.xlu0 %760 }
 0x2a1   : > { %v762_v41 = vrot.slane %v761_v40, 4 }
 0x2a3   : > { %v763_v42 = vadd.f32 %v762_v41, %v761_v40 }
 0x2a5   : > { %v764_v43 = vrot.slane %v763_v42, 2 }
 0x2a7   : > { %v765_v44 = vadd.f32 %v764_v43, %v763_v42 }
 0x2a9   : > { %v766_v45 = vrot.slane %v765_v44, 1 }
 0x2ab   : > { %v767_v46 = vadd.f32 %v766_v45, %v765_v44 }
 0x2ad   : > { %923 = vpush %v767_v46 }
 0x2de   : > { %s924_s16 = spop %923 }
 0x2df   : > { %s769_s22 = smul.f32 0.03125, %s924_s16 }
 0x2e1   : > { %771 = sst [smem:[#allocation12]] %s769_s22 }
 0x2e2 PF: > { %p965_p4 = scmp.eq.s32.totalorder %s1308_s28, 1  ;;  %s1573_s24 = sld [smem:[#allocation22_spill]] }
 0x2e3   : > { %s1248_s17 = smov [#allocation12]  }
 0x2e8   : > { %s778_s11 = sshll.u32 %s1573_s24, 4  ;;  %s779_s11 = int_to_ptr.hbm [resolvable:$true] %s778_s11 }
 0x2e9   : > { %940 = dma.smem_to_hbm (%p965_p4), %s1248_s17, 16, %s779_s11, [#allocation5]  }
 0x2ea   : > { %1222 = dma.done.wait (%p965_p4), [#allocation5], 16  }
 0x2eb   : > { %1224 = vsyncadd (%p965_p4), [#allocation5], 4294967280 }
 0x2ec   : > { %787 = sfence }
 0x2ed PF: > { %s1574_s27 = sld [smem:[#allocation18_spill]]  ;;  %s1577_s24 = smov %s1231_s25 }
 0x2ee   : > { %s1575_s30 = sld [smem:[#allocation17_spill]] }
 0x2ef   : > { %s1576_s26 = sld [smem:[#allocation19_spill]] }
 0x2f3   : > { %p22_p5 = scmp.ge.s32.totalorder %s1574_s27, 4  }
 0x2f4   : > { %s1578_s25 = smov %s1575_s30 }
 0x2f5   :  { %24 = sbr.rel (!%p22_p5) target bundleno = 11 (0xb), region = 126 }
 0x2fa   :  { %793 = vsyncpa [#allocation4], 1 }
 0x2fb   :  { %795 = vsyncpa [#allocation4 + $0x1], 1 }
 0x2fc   :  { %796 = vsyncpa [#allocation7], 1 }
 0x2fd   :  { %798 = vsyncpa [#allocation7 + $0x1], 1 }
 0x2fe   :  { %799 = vsyncpa [#allocation10], 1 }
 0x2ff   :  { %800 = vsyncpa [#allocation5], 1 }
 0x300   :  { %802 = vsyncpa [#allocation5 + $0x1], 1 }

// kernel: tpu_custom_call.1
= control target key start
LH: loop header
LB: loop body
LE: loop exit
PB: predicated region body
PF: predicated region fallthrough
CT: control target
= control target key end

     0   :  { %s1544_s0 = inlined_call_operand.hbm [shape: f32[32,256], index: 0, kind: input, shape index: {}]   ;;  %s1545_s1 = inlined_call_operand.hbm [shape: f32[32,128], index: 1, kind: input, shape index: {}]   ;;  %s1546_s2 = inlined_call_operand.hbm [shape: f32[32,128], index: 2, kind: input, shape index: {}]   ;;  %s1547_s3 = inlined_call_operand.hbm [shape: f32[256,128], index: 3, kind: input, shape index: {}]   ;;  %s1548_s4 = inlined_call_operand.vmem [shape: f32[1,128], index: 4, kind: input, shape index: {}]   ;;  %s1549_s5 = inlined_call_operand.hbm [shape: f32[128,128], index: 5, kind: input, shape index: {}]   ;;  %s1550_s6 = inlined_call_operand.vmem [shape: f32[1,128], index: 6, kind: input, shape index: {}]   ;;  %s1551_s7 = inlined_call_operand.hbm [shape: f32[1,1], index: 7, kind: output, shape index: {}]  }
   0x1   :  { %1559 = sst [smem:[#allocation20_spill]] %s1545_s1 }
   0x2   :  { %1560 = sst [smem:[#allocation21_spill]] %s1547_s3 }
   0x3   :  { %1561 = sst [smem:[#allocation22_spill]] %s1551_s7 }
   0x4   :  { %12 = vsyncpa [#allocation4], 0 }
   0x5   :  { %14 = vsyncpa [#allocation4 + $0x1], 0 }
   0x6   :  { %15 = vsyncpa [#allocation7], 0 }
   0x7   :  { %17 = vsyncpa [#allocation7 + $0x1], 0 }
   0x8   :  { %18 = vsyncpa [#allocation10], 0 }
   0x9   :  { %19 = vsyncpa [#allocation5], 0  ;;  %s1289_s24 = smov 0   ;;  %s1291_s25 = smov 0  }
   0xa   :  { %s1293_s26 = smov 0   ;;  %s1295_s27 = smov 0  }
   0xb LB: > { %1562 = sst [smem:[#allocation17_spill]] %s1235_s26  ;;  %s1308_s28 = sadd.s32 4294967295, %s1239_s27   ;;  %s1239_s27 = sphi %s1295_s27, %s1574_s27   ;;  %s1235_s26 = sphi %s1293_s26, %s1576_s26   ;;  %s1231_s25 = sphi %s1291_s25, %s1578_s25   ;;  %s1227_s24 = sphi %s1289_s24, %s1577_s24  }
   0xc   : > { %p45_p0 = scmp.ne.s32.totalorder %s1231_s25, %s1227_s24  ;;  %p46_p1 = scmp.eq.s32.totalorder %s1308_s28, 0 }
   0xd   : > { %p893_p2 = scmp.ge.s32.totalorder %s1239_s27, 1  ;;  %p213_p3 = scmp.lt.s32.totalorder %s1239_s27, 3 }
   0xe   : > { %p894_p4 = scmp.ne.s32.totalorder %s1308_s28, 0  ;;  %p1317_p5 = por %p46_p1, %p45_p0 }
   0xf   : > { %s1564_s3 = sld [smem:[#allocation21_spill]]  ;;  %p1324_p6 = pnand %p893_p2, %p213_p3 }
  0x10   : > { %s1241_s11 = smov [#allocation9]   ;;  %s1337_s14 = sadd.s32 1, %s1239_s27  }
  0x11   : > { %p943_p7 = pneg %p1324_p6  ;;  %s226_s12 = sshll.u32 %s1241_s11, 4  ;;  %s227_s12 = int_to_ptr.vmem [resolvable:$true] %s226_s12 }
  0x12   : > { %1567 = sst [smem:[#allocation18_spill]] %s1337_s14  ;;  %s1552_s15 = smov 128  }
  0x13   : > { %p1332_p8 = pnand %p943_p7, %p46_p1  ;;  %s1554_s16 = smov 8  }
  0x14   : > { %s29_s17 = ssub.s32 %s1239_s27, %s1337_s14  ;;  %s32_s18 = sadd.s32 1, %s1235_s26 }
  0x15   : > { %s224_s9 = sshll.u32 %s1564_s3, 4  ;;  %p30_p9 = scmp.eq.s32.totalorder %s29_s17, 0  ;;  %s225_s9 = int_to_ptr.hbm [resolvable:$true] %s224_s9 }
  0x16   : > { %946 = dma.hbm_to_vmem [thread:$0]  (!%p1332_p8), %s225_s9, 4096, %s227_s12, [#allocation10], %s1552_s15, %s1552_s15, %s1554_s16  }
  0x17   : > { %p39_p10 = scmp.ne.s32.totalorder %s1235_s26, %s1231_s25  ;;  %p40_p11 = scmp.eq.s32.totalorder %s1239_s27, 0 }
  0x18   : > { %p962_p12 = scmp.lt.s32.totalorder %s1239_s27, 2  ;;  %s1355_s20 = sand.u32 1, %s1235_s26  }
  0x19   : > { %s1352_s19 = scalar_select %p30_p9, %s1235_s26, %s32_s18  }
  0x1a   : > { %p41_p13 = por %p40_p11, %p39_p10  ;;  %s283_s21 = sand.u32 1, %s1239_s27  }
  0x1b   : > { %1568 = sst [smem:[#allocation19_spill]] %s1352_s19  ;;  %s901_s22 = sshll.u32 %s1355_s20, 4 }
  0x1c   : > { %p1359_p0 = pnand %p962_p12, %p41_p13  ;;  %s921_s24 = sshll.u32 %s1239_s27, 4 }
  0x1d   : > { %s1570_s1 = sld [smem:[#allocation20_spill]]  ;;  %s287_s12 = scalar_lea.vmem [#allocation6], %s901_s22 }
  0x1e   : > { %s295_s17 = sshll.u32 %s287_s12, 4  ;;  %s1367_s18 = scalar_lea.sflag [#allocation7], %s283_s21  ;;  %s296_s17 = int_to_ptr.vmem [resolvable:$true] %s295_s17 }
  0x1f   : > { %p1063_p3 = pneg %p1359_p0 }
  0x23   : > { %s292_s9 = scalar_lea.hbm %s1570_s1, %s921_s24  ;;  %s1066_s8 = scalar_lea.hbm %s1570_s1, 32 }
  0x24   : > { %s293_s11 = sshll.u32 %s292_s9, 4  ;;  %s294_s11 = int_to_ptr.hbm [resolvable:$true] %s293_s11 }
  0x25   : > { %s1059_s15 = sshra.s32 %s294_s11, 4  ;;  %s1060_s15 = int_to_ptr.hbm [resolvable:$true] %s1059_s15 }
  0x26   : > { %s1061_s16 = scalar_lea.hbm %s1060_s15, 16  ;;  %p1067_p10 = scmp.lt.s32.totalorder %s1060_s15, %s1570_s1 }
  0x27   : > { %p1062_p2 = scmp.ne.s32.totalorder %s1060_s15, %s1061_s16  ;;  %p1068_p11 = scmp.lt.s32.totalorder %s1066_s8, %s1061_s16 }
  0x29   : > { %p1064_p7 = pnand %p1063_p3, %p1062_p2  ;;  %p1069_p12 = por %p1068_p11, %p1067_p10 }
  0x2b   : > { %p1065_p9 = pneg %p1064_p7 }
  0x2d   : > { %p1070_p13 = pnand %p1069_p12, %p1065_p9 }
  0x2f   : > { %1073 = shalt.err (!%p1070_p13)
}
  0x30   : > { %s1571_s21 = smov 8   ;;  %s1572_s19 = smov 128  }
  0x31   : > { %956 = dma.hbm_to_vmem [thread:$0]  (!%p1359_p0), %s294_s11, 256, %s296_s17, %s1367_s18, %s1572_s19, %s1572_s19, %s1571_s21  }
  0x32   : > { %s314_s26 = scalar_lea.hbm %s1546_s2, %s921_s24  ;;  %s309_s15 = scalar_lea.vmem [#allocation8], %s901_s22 }
  0x33   : > { %s315_s9 = sshll.u32 %s314_s26, 4  ;;  %s317_s16 = sshll.u32 %s309_s15, 4  ;;  %s1389_s9 = int_to_ptr.hbm [resolvable:$true] %s315_s9  ;;  %s1391_s16 = int_to_ptr.vmem [resolvable:$true] %s317_s16 }
  0x34   : > { %s241_s1 = sshll.u32 %s1549_s5, 4  ;;  %s1244_s14 = smov [#allocation11]   ;;  %s242_s1 = int_to_ptr.hbm [resolvable:$true] %s241_s1 }
  0x35   : > { %s243_s7 = sshll.u32 %s1244_s14, 4  ;;  %s897_s26 = sshll.u32 %s1355_s20, 5  ;;  %s244_s7 = int_to_ptr.vmem [resolvable:$true] %s243_s7 }
  0x36   : > { %949 = dma.hbm_to_vmem [thread:$0]  (!%p1332_p8), %s242_s1, 2048, %s244_s7, [#allocation10], %s1572_s19, %s1572_s19, %s1571_s21  }
  0x37   : > { %s920_s22 = sshll.u32 %s1239_s27, 5  ;;  %s264_s30 = scalar_lea.vmem [#allocation3], %s897_s26 }
  0x38   : > { %s270_s17 = scalar_lea.hbm %s1544_s0, %s920_s22  ;;  %s273_s15 = sshll.u32 %s264_s30, 4  ;;  %s274_s15 = int_to_ptr.vmem [resolvable:$true] %s273_s15 }
  0x39   : > { %s271_s3 = sshll.u32 %s270_s17, 4  ;;  %s261_s8 = scalar_lea.sflag [#allocation4], %s1355_s20  ;;  %s272_s3 = int_to_ptr.hbm [resolvable:$true] %s271_s3 }
  0x3a   : > { %s1119_s14 = sshra.s32 %s272_s3, 4  ;;  %s1126_s27 = scalar_lea.hbm %s1544_s0, 64  ;;  %s1120_s14 = int_to_ptr.hbm [resolvable:$true] %s1119_s14 }
  0x3b   : > { %s1121_s12 = scalar_lea.hbm %s1120_s14, 32  ;;  %p1127_p9 = scmp.lt.s32.totalorder %s1120_s14, %s1544_s0 }
  0x3c   : > { %p1122_p2 = scmp.ne.s32.totalorder %s1120_s14, %s1121_s12  ;;  %p1128_p10 = scmp.lt.s32.totalorder %s1126_s27, %s1121_s12 }
  0x3e   : > { %p1124_p7 = pnand %p1122_p2, %p1063_p3  ;;  %p1129_p11 = por %p1128_p10, %p1127_p9 }
  0x40   : > { %p1125_p8 = pneg %p1124_p7 }
  0x42   : > { %p1130_p12 = pnand %p1129_p11, %p1125_p8 }
  0x44   : > { %1133 = shalt.err (!%p1130_p12)
}
  0x45   : > { %s1245_s20 = smov 256   ;;  %s1246_s26 = smov 16  }
  0x46   : > { %953 = dma.hbm_to_vmem [thread:$0]  (!%p1359_p0), %s272_s3, 512, %s274_s15, %s261_s8, %s1245_s20, %s1245_s20, %s1246_s26  }
  0x47   : > { %s1149_s24 = sshra.s32 %s1389_s9, 4  ;;  %s1156_s14 = scalar_lea.hbm %s1546_s2, 32  ;;  %s1150_s24 = int_to_ptr.hbm [resolvable:$true] %s1149_s24 }
  0x48   : > { %s1151_s11 = scalar_lea.hbm %s1150_s24, 16  ;;  %p1157_p8 = scmp.lt.s32.totalorder %s1150_s24, %s1546_s2 }
  0x49   : > { %p1152_p13 = scmp.ne.s32.totalorder %s1150_s24, %s1151_s11  ;;  %p1158_p9 = scmp.lt.s32.totalorder %s1156_s14, %s1151_s11 }
  0x4b   : > { %p1154_p2 = pnand %p1152_p13, %p1063_p3  ;;  %p1159_p10 = por %p1158_p9, %p1157_p8 }
  0x4d   : > { %p1155_p7 = pneg %p1154_p2 }
  0x4f   : > { %p1160_p11 = pnand %p1159_p10, %p1155_p7 }
  0x51   : > { %1163 = shalt.err (!%p1160_p11)
}
  0x52   : > { %959 = dma.hbm_to_vmem [thread:$0]  (!%p1359_p0), %s1389_s9, 256, %s1391_s16, %s1367_s18, %s1572_s19, %s1572_s19, %s1571_s21  }
  0x53   : > { %329 = sbr.rel (%p1324_p6) target bundleno = 749 (0x2ed), region = 48  ;;  %s331_s3 = sand.u32 (!%p1324_p6), 1, %s1231_s25  }
  0x54   : > { %s908_s15 = sshll.u32 (!%p1324_p6), %s331_s3, 5  ;;  %s332_s8 = scalar_lea.sflag (!%p1324_p6), [#allocation4], %s331_s3 }
  0x55   : > { %s335_s7 = scalar_lea.vmem (!%p1324_p6), [#allocation3], %s908_s15 }
  0x58   : > { %1210 = dma.done.wait (%p1317_p5), %s332_s8, 512  }
  0x59   : > { %1212 = vsyncadd (%p1317_p5), %s332_s8, 4294966784  ;;  %s341_s23 = sand.u32 1, %s1308_s28   ;;  %s909_s27 = sshll.u32 %s331_s3, 4 }
  0x5a   : > { %s342_s13 = scalar_lea.sflag [#allocation7], %s341_s23  ;;  %s1444_s19 = scalar_lea.vmem [#allocation6], %s909_s27 }
  0x5b   : > { %1214 = dma.done.wait (%p1317_p5), %s342_s13, 512  }
  0x5c   : > { %1216 = vsyncadd (%p1317_p5), %s342_s13, 4294966784  ;;  %s355_s10 = scalar_lea.vmem [#allocation8], %s909_s27 }
  0x5d   : > { %1218 = dma.done.wait (%p46_p1), [#allocation10], 6144  }
  0x5e   : > { %1220 = vsyncadd (%p46_p1), [#allocation10], 4294961152  ;;  %408 = sbr.rel (%p894_p4) target bundleno = 102 (0x66), region = 72 }
  0x63   : > { %vm409_vm0 = vcmask 7168   ;;  %v1247_v0 = vmov 0.0  }
  0x64   : > { %410 = vst.msk [vmem:[#allocation2] sm:$0xff] %vm409_vm0, %v1247_v0 }
  0x65   : > { %411 = vst.msk [vmem:[#allocation2 + $0x8] sm:$0xff] %vm409_vm0, %v1247_v0 }
  0x66 PF: > { %v1456_v1 = vld [vmem:[%s355_s10 + $0x8] sm:$0xff]  ;;  %v1459_v2 = vld [vmem:[%s1444_s19] sm:$0xff]  ;;  %p914_p1 = scmp.ne.s32.totalorder %s1308_s28, 1 }
  0x67   : > { %v1461_v3 = vld [vmem:[%s335_s7] sm:$0xff]  ;;  %v487_v4 = vmul.f32 %v1456_v1, %v1456_v1  ;;  %v454_v5 = vmul.f32 %v1459_v2, %v1459_v2  ;;  %v1467_v6 = vld [vmem:[%s335_s7 + $0x8] sm:$0xff]  ;;  %v1471_v8 = vld [vmem:[%s335_s7 + $0x10] sm:$0xff] }
  0x68   : > { %v416_v7 = vmul.f32 %v1461_v3, %v1461_v3  ;;  %v417_v9 = vmul.f32 %v1467_v6, %v1467_v6  ;;  %v1475_v10 = vld [vmem:[%s335_s7 + $0x18] sm:$0xff]  ;;  %v418_v12 = vmul.f32 %v1471_v8, %v1471_v8  ;;  %v614_v16 = vld [vmem:[#allocation11 + $0x70] sm:$0xff]  ;;  %v613_v21 = vld [vmem:[#allocation11 + $0x68] sm:$0xff] }
  0x69   : > { %v615_v11 = vld [vmem:[#allocation11 + $0x78] sm:$0xff]  ;;  %490 = vadd.xlane.f32.xlu2 %v487_v4  ;;  %456 = vadd.xlane.f32.xlu0 %v454_v5  ;;  %v419_v13 = vmul.f32 %v1475_v10, %v1475_v10  ;;  %v1481_v18 = vld [vmem:[%s355_s10] sm:$0xff]  ;;  %v529_v23 = vld [vmem:[#allocation9 + $0x68] sm:$0xff] }
  0x6a   : > { %v531_v14 = vld [vmem:[#allocation9 + $0x78] sm:$0xff]  ;;  %v420_v17 = vadd.f32 %v417_v9, %v416_v7  ;;  %620 = vmatpush.msra.mxu2 %v615_v11  ;;  %v530_v19 = vld [vmem:[#allocation9 + $0x70] sm:$0xff]  ;;  %645 = vmatpush.msra.mxu3 %v615_v11  ;;  %v545_v24 = vld [vmem:[#allocation9 + $0xe8] sm:$0xff]  ;;  %v486_v25 = vmul.f32 %v1481_v18, %v1481_v18 }
  0x6b   : > { %v547_v15 = vld [vmem:[#allocation9 + $0xf8] sm:$0xff]  ;;  %552 = vmatpush.msra.mxu0 %v531_v14  ;;  %v546_v20 = vld [vmem:[#allocation9 + $0xf0] sm:$0xff]  ;;  %v423_v26 = vadd.f32 %v419_v13, %v418_v12  ;;  %v612_v27 = vld [vmem:[#allocation11 + $0x60] sm:$0xff] }
  0x6c   : > { %575 = vmatpush.msra.mxu1 %v547_v15  ;;  %421 = vadd.xlane.f32.xlu1 %v420_v17  ;;  %v1484_v22 = vld [vmem:[%s1444_s19 + $0x8] sm:$0xff]  ;;  %v528_v28 = vld [vmem:[#allocation9 + $0x60] sm:$0xff]  ;;  %v610_v34 = vld [vmem:[#allocation11 + $0x50] sm:$0xff] }
  0x6d   : > { %621 = vmatpush.msra.mxu2 %v614_v16  ;;  %553 = vmatpush.msra.mxu0 %v530_v19  ;;  %v544_v29 = vld [vmem:[#allocation9 + $0xe0] sm:$0xff]  ;;  %v455_v30 = vmul.f32 %v1484_v22, %v1484_v22  ;;  %v611_v31 = vld [vmem:[#allocation11 + $0x58] sm:$0xff]  ;;  %v526_v35 = vld [vmem:[#allocation9 + $0x50] sm:$0xff] }
  0x6e   : > { %576 = vmatpush.msra.mxu1 %v546_v20  ;;  %646 = vmatpush.msra.mxu3 %v614_v16  ;;  %v527_v32 = vld [vmem:[#allocation9 + $0x58] sm:$0xff]  ;;  %v542_v36 = vld [vmem:[#allocation9 + $0xd0] sm:$0xff]  ;;  %v609_v37 = vld [vmem:[#allocation11 + $0x48] sm:$0xff] }
  0x6f   : > { %622 = vmatpush.msra.mxu2 %v613_v21  ;;  %554 = vmatpush.msra.mxu0 %v529_v23  ;;  %v543_v33 = vld [vmem:[#allocation9 + $0xd8] sm:$0xff]  ;;  %v525_v38 = vld [vmem:[#allocation9 + $0x48] sm:$0xff]  ;;  %v608_v40 = vld [vmem:[#allocation11 + $0x40] sm:$0xff] }
  0x70   : > { %577 = vmatpush.msra.mxu1 %v545_v24  ;;  %647 = vmatpush.msra.mxu3 %v613_v21  ;;  %v541_v39 = vld [vmem:[#allocation9 + $0xc8] sm:$0xff]  ;;  %v524_v41 = vld [vmem:[#allocation9 + $0x40] sm:$0xff]  ;;  %v607_v43 = vld [vmem:[#allocation11 + $0x38] sm:$0xff] }
  0x71   : > { %623 = vmatpush.msra.mxu2 %v612_v27  ;;  %488 = vadd.xlane.f32.xlu0 %v486_v25  ;;  %v540_v42 = vld [vmem:[#allocation9 + $0xc0] sm:$0xff]  ;;  %v523_v44 = vld [vmem:[#allocation9 + $0x38] sm:$0xff]  ;;  %v606_v46 = vld [vmem:[#allocation11 + $0x30] sm:$0xff] }
  0x72   : > { %424 = vadd.xlane.f32.xlu2 %v423_v26  ;;  %555 = vmatpush.msra.mxu0 %v528_v28  ;;  %v539_v45 = vld [vmem:[#allocation9 + $0xb8] sm:$0xff]  ;;  %v522_v47 = vld [vmem:[#allocation9 + $0x30] sm:$0xff]  ;;  %v605_v49 = vld [vmem:[#allocation11 + $0x28] sm:$0xff] }
  0x73   : > { %578 = vmatpush.msra.mxu1 %v544_v29  ;;  %624 = vmatpush.msra.mxu2 %v611_v31  ;;  %v538_v48 = vld [vmem:[#allocation9 + $0xb0] sm:$0xff]  ;;  %v521_v50 = vld [vmem:[#allocation9 + $0x28] sm:$0xff]  ;;  %v604_v52 = vld [vmem:[#allocation11 + $0x20] sm:$0xff] }
  0x74   : > { %648 = vmatpush.msra.mxu3 %v612_v27  ;;  %458 = vadd.xlane.f32.xlu1 %v455_v30  ;;  %v537_v51 = vld [vmem:[#allocation9 + $0xa8] sm:$0xff]  ;;  %v520_v53 = vld [vmem:[#allocation9 + $0x20] sm:$0xff]  ;;  %v603_v55 = vld [vmem:[#allocation11 + $0x18] sm:$0xff] }
  0x75   : > { %556 = vmatpush.msra.mxu0 %v527_v32  ;;  %579 = vmatpush.msra.mxu1 %v543_v33  ;;  %v536_v54 = vld [vmem:[#allocation9 + $0xa0] sm:$0xff]  ;;  %v519_v56 = vld [vmem:[#allocation9 + $0x18] sm:$0xff]  ;;  %v602_v58 = vld [vmem:[#allocation11 + $0x10] sm:$0xff] }
  0x76   : > { %649 = vmatpush.msra.mxu3 %v611_v31  ;;  %625 = vmatpush.msra.mxu2 %v610_v34  ;;  %v535_v57 = vld [vmem:[#allocation9 + $0x98] sm:$0xff]  ;;  %v518_v59 = vld [vmem:[#allocation9 + $0x10] sm:$0xff]  ;;  %v601_v61 = vld [vmem:[#allocation11 + $0x8] sm:$0xff] }
  0x77   : > { %557 = vmatpush.msra.mxu0 %v526_v35  ;;  %580 = vmatpush.msra.mxu1 %v542_v36  ;;  %v534_v60 = vld [vmem:[#allocation9 + $0x90] sm:$0xff]  ;;  %v517_v62 = vld [vmem:[#allocation9 + $0x8] sm:$0xff]  ;;  %v600_v0 = vld [vmem:[#allocation11] sm:$0xff] }
  0x78   : > { %650 = vmatpush.msra.mxu3 %v610_v34  ;;  %626 = vmatpush.msra.mxu2 %v609_v37  ;;  %v533_v63 = vld [vmem:[#allocation9 + $0x88] sm:$0xff]  ;;  %v516_v4 = vld [vmem:[#allocation9] sm:$0xff] }
  0x79   : > { %558 = vmatpush.msra.mxu0 %v525_v38  ;;  %581 = vmatpush.msra.mxu1 %v541_v39  ;;  %v532_v5 = vld [vmem:[#allocation9 + $0x80] sm:$0xff] }
  0x7a   : > { %651 = vmatpush.msra.mxu3 %v609_v37  ;;  %627 = vmatpush.msra.mxu2 %v608_v40 }
  0x7b   : > { %559 = vmatpush.msra.mxu0 %v524_v41  ;;  %582 = vmatpush.msra.mxu1 %v540_v42 }
  0x7c   : > { %652 = vmatpush.msra.mxu3 %v608_v40  ;;  %628 = vmatpush.msra.mxu2 %v607_v43 }
  0x7d   : > { %560 = vmatpush.msra.mxu0 %v523_v44  ;;  %583 = vmatpush.msra.mxu1 %v539_v45 }
  0x7e   : > { %653 = vmatpush.msra.mxu3 %v607_v43  ;;  %629 = vmatpush.msra.mxu2 %v606_v46 }
  0x7f   : > { %561 = vmatpush.msra.mxu0 %v522_v47  ;;  %584 = vmatpush.msra.mxu1 %v538_v48 }
  0x80   : > { %654 = vmatpush.msra.mxu3 %v606_v46  ;;  %630 = vmatpush.msra.mxu2 %v605_v49 }
  0x81   : > { %562 = vmatpush.msra.mxu0 %v521_v50  ;;  %585 = vmatpush.msra.mxu1 %v537_v51 }
  0x82   : > { %655 = vmatpush.msra.mxu3 %v605_v49  ;;  %631 = vmatpush.msra.mxu2 %v604_v52 }
  0x83   : > { %563 = vmatpush.msra.mxu0 %v520_v53  ;;  %586 = vmatpush.msra.mxu1 %v536_v54 }
  0x84   : > { %656 = vmatpush.msra.mxu3 %v604_v52  ;;  %632 = vmatpush.msra.mxu2 %v603_v55 }
  0x85   : > { %564 = vmatpush.msra.mxu0 %v519_v56  ;;  %587 = vmatpush.msra.mxu1 %v535_v57 }
  0x86   : > { %657 = vmatpush.msra.mxu3 %v603_v55  ;;  %633 = vmatpush.msra.mxu2 %v602_v58 }
  0x87   : > { %565 = vmatpush.msra.mxu0 %v518_v59  ;;  %588 = vmatpush.msra.mxu1 %v534_v60 }
  0x88   : > { %658 = vmatpush.msra.mxu3 %v602_v58  ;;  %634 = vmatpush.msra.mxu2 %v601_v61 }
  0x89   : > { %566 = vmatpush.msra.mxu0 %v517_v62  ;;  %589 = vmatpush.msra.mxu1 %v533_v63 }
  0x8a   : > { %659 = vmatpush.msra.mxu3 %v601_v61  ;;  %635 = vmatpush.msra.mxu2 %v600_v0 }
  0x8b   : > { %567 = vmatpush.msra.mxu0 %v516_v4  ;;  %590 = vmatpush.msra.mxu1 %v532_v5 }
  0x8c   : > { %660 = vmatpush.msra.mxu3 %v600_v0 }
  0xdc   : > { %v491_v7 = vpop.xlane.xlu2 %490  ;;  %v457_v9 = vpop.xlane.xlu0 %456 }
  0xdd   : > { %v1490_v11 = vmax.f32 %v491_v7, 1e-24  ;;  %v460_v12 = vmax.f32 %v457_v9, 1e-24 }
  0xdf   : > { %v422_v13 = vpop.xlane.xlu1 %421  ;;  %1009 = vrsqrt.f32 %v460_v12  ;;  %vm468_vm2 = vweird.f32 %v460_v12  ;;  %vm510_vm15 = vweird.f32 %v1490_v11 }
  0xe0   : > { %v426_v14 = vmax.f32 %v422_v13, 1e-24  ;;  %1011 = vrsqrt.f32 %v1490_v11 }
  0xe2   : > { %1013 = vrsqrt.f32 %v426_v14  ;;  %vm434_vm3 = vweird.f32 %v426_v14 }
  0xe4   : > { %v489_v15 = vpop.xlane.xlu0 %488 }
  0xe5   : > { %v425_v16 = vpop.xlane.xlu2 %424  ;;  %v492_v17 = vmax.f32 %v489_v15, 1e-24  ;;  %v1010_v20 = vpop.eup %1009 }
  0xe6   : > { %v1493_v19 = vmax.f32 %v425_v16, 1e-24  ;;  %v1495_v21 = vpop.eup %1011  ;;  %v463_v23 = vmul.f32 %v1010_v20, %v460_v12  ;;  %vm469_vm1 = vweird.f32 %v1010_v20 }
  0xe7   : > { %1015 = vrsqrt.f32 %v492_v17  ;;  %v459_v24 = vpop.xlane.xlu1 %458  ;;  %v505_v29 = vmul.f32 %v1495_v21, %v1490_v11  ;;  %vm470_vm5 = vmor %vm468_vm2, %vm469_vm1  ;;  %vm500_vm10 = vweird.f32 %v492_v17  ;;  %vm511_vm1 = vweird.f32 %v1495_v21  ;;  %v1007_v11 = vld [vmem:[%s1548_s4] ss:$0 sm:$0xff] }
  0xe8   : > { %v1014_v25 = vpop.eup %1013  ;;  %1017 = vrsqrt.f32 %v1493_v19  ;;  %v461_v26 = vmax.f32 %v459_v24, 1e-24  ;;  %v464_v27 = vmul.f32 %v1010_v20, %v463_v23  ;;  %vm444_vm8 = vweird.f32 %v1493_v19  ;;  %vm512_vm2 = vmor %vm510_vm15, %vm511_vm1 }
  0xe9   : > { %v429_v28 = vmul.f32 %v1014_v25, %v426_v14  ;;  %v506_v36 = vmul.f32 %v1495_v21, %v505_v29  ;;  %vm435_vm4 = vweird.f32 %v1014_v25 }
  0xea   : > { %1019 = vrsqrt.f32 %v461_v26  ;;  %v465_v30 = vmul.f32 0.5, %v464_v27  ;;  %vm436_vm6 = vmor %vm434_vm3, %vm435_vm4  ;;  %vm478_vm11 = vweird.f32 %v461_v26 }
  0xeb   : > { %v430_v31 = vmul.f32 %v1014_v25, %v429_v28  ;;  %v507_v47 = vmul.f32 0.5, %v506_v36 }
  0xec   : > { %v466_v33 = vsub.f32 1.5, %v465_v30 }
  0xed   : > { %v1016_v32 = vpop.eup %1015  ;;  %v431_v34 = vmul.f32 0.5, %v430_v31  ;;  %v508_v58 = vsub.f32 1.5, %v507_v47 }
  0xee   : > { %v1018_v35 = vpop.eup %1017  ;;  %v495_v37 = vmul.f32 %v1016_v32, %v492_v17  ;;  %v467_v40 = vmul.f32 %v1010_v20, %v466_v33  ;;  %vm501_vm7 = vweird.f32 %v1016_v32 }
  0xef   : > { %v432_v38 = vsub.f32 1.5, %v431_v34  ;;  %v439_v39 = vmul.f32 %v1018_v35, %v1493_v19  ;;  %vm445_vm9 = vweird.f32 %v1018_v35  ;;  %vm502_vm12 = vmor %vm500_vm10, %vm501_vm7  ;;  %v509_v63 = vmul.f32 %v1495_v21, %v508_v58 }
  0xf0   : > { %v1020_v41 = vpop.eup %1019  ;;  %v496_v42 = vmul.f32 %v1016_v32, %v495_v37  ;;  %v471_v45 = vsel %vm470_vm5, %v1010_v20, %v467_v40  ;;  %vm446_vm14 = vmor %vm444_vm8, %vm445_vm9  ;;  %vm748_vm8 = vcmask 7168  }
  0xf1   : > { %v440_v43 = vmul.f32 %v1018_v35, %v439_v39  ;;  %v473_v44 = vmul.f32 %v1020_v41, %v461_v26  ;;  %v433_v46 = vmul.f32 %v1014_v25, %v432_v38  ;;  %v482_v49 = vmul.f32 %v471_v45, %v1459_v2 }
  0xf2   : > { %v497_v48 = vmul.f32 0.5, %v496_v42  ;;  %vm479_vm13 = vweird.f32 %v1020_v41 }
  0xf3   : > { %v441_v50 = vmul.f32 0.5, %v440_v43  ;;  %v474_v51 = vmul.f32 %v1020_v41, %v473_v44  ;;  %v437_v52 = vsel %vm436_vm6, %v1014_v25, %v433_v46  ;;  %636 = vmatmul.f32.vlgmr.msra.gmra.mxu2 %v482_v49  ;;  %vm480_vm0 = vmor %vm478_vm11, %vm479_vm13 }
  0xf4   : > { %v498_v53 = vsub.f32 1.5, %v497_v48  ;;  %v448_v54 = vmul.f32 %v437_v52, %v1461_v3  ;;  %v449_v55 = vmul.f32 %v437_v52, %v1467_v6 }
  0xf5   : > { %v442_v56 = vsub.f32 1.5, %v441_v50  ;;  %v475_v57 = vmul.f32 0.5, %v474_v51 }
  0xf6   : > { %568 = vmatmul.f32.vlgmr.msra.gmra.mxu0 %v448_v54  ;;  %591 = vmatmul.f32.vlgmr.msra.gmra.mxu1 %v449_v55  ;;  %v499_v2 = vmul.f32 %v1016_v32, %v498_v53 }
  0xf7   : > { %v476_v59 = vsub.f32 1.5, %v475_v57  ;;  %v443_v60 = vmul.f32 %v1018_v35, %v442_v56 }
  0xf8   : > { %v503_v61 = vsel %vm502_vm12, %v1016_v32, %v499_v2 }
  0xf9   : > { %v514_v3 = vmul.f32 %v503_v61, %v1481_v18  ;;  %v447_v6 = vsel %vm446_vm14, %v1018_v35, %v443_v60  ;;  %v477_v62 = vmul.f32 %v1020_v41, %v476_v59  ;;  %v513_v18 = vsel %vm512_vm2, %v1495_v21, %v509_v63 }
  0xfa   : > { %v450_v4 = vmul.f32 %v447_v6, %v1471_v8  ;;  %v451_v5 = vmul.f32 %v447_v6, %v1475_v10  ;;  %v515_v9 = vmul.f32 %v513_v18, %v1456_v1  ;;  %v1008_v8 = vld [vmem:[%s1550_s6] ss:$0 sm:$0xff] }
  0xfb   : > { %661 = vmatmul.f32.vlgmr.msra.gmra.mxu3 %v514_v3  ;;  %v481_v0 = vsel %vm480_vm0, %v1020_v41, %v477_v62 }
  0xfc   : > { %v483_v7 = vmul.f32 %v481_v0, %v1484_v22 }
  0xfe   : > { %571 = vmatmul.f32.gmra.mxu0 %v450_v4  ;;  %594 = vmatmul.f32.gmra.mxu1 %v451_v5 }
  0xff   : > { %639 = vmatmul.f32.gmra.mxu2 %v483_v7 }
 0x103   : > { %664 = vmatmul.f32.gmra.mxu3 %v515_v9 }
 0x173   : > { %v569_v12 = vpop.f32.mrf.mxu0  ;;  %v592_v10 = vpop.f32.mrf.mxu1 }
 0x174   : > { %v570_v13 = vadd.f32 %v1007_v11, %v569_v12 }
 0x176   : > { %v593_v22 = vadd.f32 %v592_v10, %v570_v13  ;;  %v637_v14 = vpop.f32.mrf.mxu2 }
 0x177   : > { %v638_v15 = vadd.f32 %v1008_v8, %v637_v14 }
 0x178   : > { %v598_v16 = vmax.f32 %v593_v22, 0.0 }
 0x179   : > { %v643_v17 = vmax.f32 %v638_v15, 0.0 }
 0x17b   : > { %v572_v19 = vpop.f32.mrf.mxu0  ;;  %v670_v20 = vsub.f32 %v598_v16, %v643_v17  ;;  %v595_v25 = vpop.f32.mrf.mxu1 }
 0x17c   : > { %v573_v1 = vadd.f32 %v1007_v11, %v572_v19 }
 0x17d   : > { %v672_v23 = vadd.f32 1e-06, %v670_v20  ;;  %v744_v20 = vld [vmem:[#allocation2] sm:$0xff] }
 0x17e   : > { %v662_v21 = vpop.f32.mrf.mxu3  ;;  %v596_v27 = vadd.f32 %v595_v25, %v573_v1 }
 0x17f   : > { %v663_v24 = vadd.f32 %v1008_v8, %v662_v21  ;;  %v674_v26 = vmul.f32 %v672_v23, %v672_v23 }
 0x180   : > { %v599_v32 = vmax.f32 %v596_v27, 0.0 }
 0x181   : > { %v668_v28 = vmax.f32 %v663_v24, 0.0  ;;  %676 = vadd.xlane.f32.xlu0 %v674_v26 }
 0x182   : > { %v640_v29 = vpop.f32.mrf.mxu2 }
 0x183   : > { %v641_v30 = vadd.f32 %v1008_v8, %v640_v29  ;;  %v704_v31 = vsub.f32 %v598_v16, %v668_v28 }
 0x185   : > { %v644_v33 = vmax.f32 %v641_v30, 0.0  ;;  %v706_v34 = vadd.f32 1e-06, %v704_v31 }
 0x186   : > { %v665_v35 = vpop.f32.mrf.mxu3 }
 0x187   : > { %v666_v36 = vadd.f32 %v1008_v8, %v665_v35  ;;  %v708_v37 = vmul.f32 %v706_v34, %v706_v34  ;;  %v671_v38 = vsub.f32 %v599_v32, %v644_v33 }
 0x189   : > { %v669_v39 = vmax.f32 %v666_v36, 0.0  ;;  %710 = vadd.xlane.f32.xlu2 %v708_v37  ;;  %v673_v40 = vadd.f32 1e-06, %v671_v38 }
 0x18b   : > { %v675_v41 = vmul.f32 %v673_v40, %v673_v40  ;;  %v705_v42 = vsub.f32 %v599_v32, %v669_v39  ;;  %v745_v32 = vld [vmem:[#allocation2 + $0x8] sm:$0xff] }
 0x18d   : > { %678 = vadd.xlane.f32.xlu1 %v675_v41  ;;  %v707_v43 = vadd.f32 1e-06, %v705_v42 }
 0x18f   : > { %v709_v44 = vmul.f32 %v707_v43, %v707_v43 }
 0x191   : > { %712 = vadd.xlane.f32.xlu0 %v709_v44 }
 0x1f4   : > { %v677_v45 = vpop.xlane.xlu0 %676 }
 0x1f5   : > { %1021 = vrsqrt.f32 %v677_v45  ;;  %vm687_vm3 = vcmp.eq.f32.partialorder %v677_v45, inf  ;;  %vm689_vm4 = vcmp.eq.f32.partialorder %v677_v45, 0.0  ;;  %v690_v9 = vand.u32 2147483648, %v677_v45 }
 0x1fb   : > { %v1022_v46 = vpop.eup %1021 }
 0x1fc   : > { %v711_v47 = vpop.xlane.xlu2 %710  ;;  %v681_v48 = vmul.f32 %v1022_v46, %v677_v45 }
 0x1fd   : > { %1023 = vrsqrt.f32 %v711_v47  ;;  %vm721_vm5 = vcmp.eq.f32.partialorder %v711_v47, inf  ;;  %v724_v11 = vand.u32 2147483648, %v711_v47  ;;  %vm723_vm6 = vcmp.eq.f32.partialorder %v711_v47, 0.0 }
 0x1fe   : > { %v682_v49 = vmul.f32 %v1022_v46, %v681_v48 }
 0x200   : > { %v679_v50 = vpop.xlane.xlu1 %678  ;;  %v683_v51 = vmul.f32 0.5, %v682_v49 }
 0x201   : > { %1025 = vrsqrt.f32 %v679_v50  ;;  %vm699_vm7 = vcmp.eq.f32.partialorder %v679_v50, inf  ;;  %v702_v24 = vand.u32 2147483648, %v679_v50  ;;  %vm701_vm10 = vcmp.eq.f32.partialorder %v679_v50, 0.0 }
 0x202   : > { %v684_v53 = vsub.f32 1.5, %v683_v51 }
 0x203   : > { %v1024_v52 = vpop.eup %1023 }
 0x204   : > { %v715_v54 = vmul.f32 %v1024_v52, %v711_v47  ;;  %v713_v55 = vpop.xlane.xlu0 %712  ;;  %v685_v56 = vmul.f32 %v1022_v46, %v684_v53 }
 0x205   : > { %1027 = vrsqrt.f32 %v713_v55  ;;  %vm733_vm9 = vcmp.eq.f32.partialorder %v713_v55, inf  ;;  %v736_v25 = vand.u32 2147483648, %v713_v55  ;;  %vm735_vm11 = vcmp.eq.f32.partialorder %v713_v55, 0.0 }
 0x206   : > { %v716_v57 = vmul.f32 %v1024_v52, %v715_v54  ;;  %v686_v60 = vmul.f32 %v685_v56, %v677_v45 }
 0x207   : > { %v1026_v58 = vpop.eup %1025 }
 0x208   : > { %v717_v2 = vmul.f32 0.5, %v716_v57  ;;  %v693_v59 = vmul.f32 %v1026_v58, %v679_v50  ;;  %v688_v4 = vsel %vm687_vm3, %v677_v45, %v686_v60 }
 0x209   : > { %v691_v10 = vsel %vm689_vm4, %v690_v9, %v688_v4 }
 0x20a   : > { %v718_v61 = vsub.f32 1.5, %v717_v2  ;;  %v694_v3 = vmul.f32 %v1026_v58, %v693_v59 }
 0x20b   : > { %v1028_v6 = vpop.eup %1027 }
 0x20c   : > { %v719_v62 = vmul.f32 %v1024_v52, %v718_v61  ;;  %v695_v63 = vmul.f32 0.5, %v694_v3  ;;  %v727_v0 = vmul.f32 %v1028_v6, %v713_v55 }
 0x20e   : > { %v720_v5 = vmul.f32 %v719_v62, %v711_v47  ;;  %v696_v7 = vsub.f32 1.5, %v695_v63  ;;  %v728_v18 = vmul.f32 %v1028_v6, %v727_v0 }
 0x210   : > { %v722_v12 = vsel %vm721_vm5, %v711_v47, %v720_v5  ;;  %v697_v13 = vmul.f32 %v1026_v58, %v696_v7  ;;  %v729_v8 = vmul.f32 0.5, %v728_v18 }
 0x211   : > { %v725_v22 = vsel %vm723_vm6, %v724_v11, %v722_v12 }
 0x212   : > { %v738_v14 = vsub.f32 %v691_v10, %v725_v22  ;;  %v698_v15 = vmul.f32 %v697_v13, %v679_v50  ;;  %v730_v16 = vsub.f32 1.5, %v729_v8 }
 0x214   : > { %v740_v17 = vadd.f32 0.1, %v738_v14  ;;  %v731_v19 = vmul.f32 %v1028_v6, %v730_v16  ;;  %v700_v21 = vsel %vm699_vm7, %v679_v50, %v698_v15 }
 0x215   : > { %v703_v28 = vsel %vm701_vm10, %v702_v24, %v700_v21 }
 0x216   : > { %v742_v1 = vmax.f32 %v740_v17, 0.0  ;;  %v732_v23 = vmul.f32 %v731_v19, %v713_v55 }
 0x218   : > { %v746_v26 = vadd.f32 %v744_v20, %v742_v1  ;;  %v734_v27 = vsel %vm733_vm9, %v713_v55, %v732_v23 }
 0x219   : > { %v737_v29 = vsel %vm735_vm11, %v736_v25, %v734_v27 }
 0x21a   : > { %749 = vst.msk [vmem:[#allocation2] sm:$0xff] %vm748_vm8, %v746_v26  ;;  %v739_v30 = vsub.f32 %v703_v28, %v737_v29 }
 0x21c   : > { %v741_v31 = vadd.f32 0.1, %v739_v30 }
 0x21e   : > { %v743_v33 = vmax.f32 %v741_v31, 0.0  ;;  %754 = sbr.rel (%p914_p1) target bundleno = 738 (0x2e2), region = 76 }
 0x220   : > { %v747_v34 = vadd.f32 %v745_v32, %v743_v33 }
 0x222   : > { %750 = vst.msk [vmem:[#allocation2 + $0x8] sm:$0xff] %vm748_vm8, %v747_v34 }
 0x223   : > { %v755_v35 = vld [vmem:[#allocation2] sm:$0xff] }
 0x224   : > { %v757_v37 = vsel %vm748_vm8, %v755_v35, 0.0 }
 0x229   : > { %v756_v36 = vld [vmem:[#allocation2 + $0x8] sm:$0xff] }
 0x22a   : > { %v758_v38 = vsel %vm748_vm8, %v756_v36, 0.0 }
 0x22b   : > { %v759_v39 = vadd.f32 %v758_v38, %v757_v37 }
 0x22d   : > { %760 = vadd.xlane.f32.xlu0 %v759_v39 }
 0x2a0   : > { %v761_v40 = vpop.xlane.xlu0 %760 }
 0x2a1   : > { %v762_v41 = vrot.slane %v761_v40, 4 }
 0x2a3   : > { %v763_v42 = vadd.f32 %v762_v41, %v761_v40 }
 0x2a5   : > { %v764_v43 = vrot.slane %v763_v42, 2 }
 0x2a7   : > { %v765_v44 = vadd.f32 %v764_v43, %v763_v42 }
 0x2a9   : > { %v766_v45 = vrot.slane %v765_v44, 1 }
 0x2ab   : > { %v767_v46 = vadd.f32 %v766_v45, %v765_v44 }
 0x2ad   : > { %923 = vpush %v767_v46 }
 0x2de   : > { %s924_s16 = spop %923 }
 0x2df   : > { %s769_s22 = smul.f32 0.03125, %s924_s16 }
 0x2e1   : > { %771 = sst [smem:[#allocation12]] %s769_s22 }
 0x2e2 PF: > { %p965_p4 = scmp.eq.s32.totalorder %s1308_s28, 1  ;;  %s1573_s24 = sld [smem:[#allocation22_spill]] }
 0x2e3   : > { %s1248_s17 = smov [#allocation12]  }
 0x2e8   : > { %s778_s11 = sshll.u32 %s1573_s24, 4  ;;  %s779_s11 = int_to_ptr.hbm [resolvable:$true] %s778_s11 }
 0x2e9   : > { %940 = dma.smem_to_hbm (%p965_p4), %s1248_s17, 16, %s779_s11, [#allocation5]  }
 0x2ea   : > { %1222 = dma.done.wait (%p965_p4), [#allocation5], 16  }
 0x2eb   : > { %1224 = vsyncadd (%p965_p4), [#allocation5], 4294967280 }
 0x2ec   : > { %787 = sfence }
 0x2ed PF: > { %s1574_s27 = sld [smem:[#allocation18_spill]]  ;;  %s1577_s24 = smov %s1231_s25 }
 0x2ee   : > { %s1575_s30 = sld [smem:[#allocation17_spill]] }
 0x2ef   : > { %s1576_s26 = sld [smem:[#allocation19_spill]] }
 0x2f3   : > { %p22_p5 = scmp.ge.s32.totalorder %s1574_s27, 4  }
 0x2f4   : > { %s1578_s25 = smov %s1575_s30 }
 0x2f5   :  { %24 = sbr.rel (!%p22_p5) target bundleno = 11 (0xb), region = 126 }
 0x2fa   :  { %793 = vsyncpa [#allocation4], 1 }
 0x2fb   :  { %795 = vsyncpa [#allocation4 + $0x1], 1 }
 0x2fc   :  { %796 = vsyncpa [#allocation7], 1 }
 0x2fd   :  { %798 = vsyncpa [#allocation7 + $0x1], 1 }
 0x2fe   :  { %799 = vsyncpa [#allocation10], 1 }
 0x2ff   :  { %800 = vsyncpa [#allocation5], 1 }
 0x300   :  { %802 = vsyncpa [#allocation5 + $0x1], 1 }

</bundles_post_ra>
